<compile_context>
chip_gen: v5e
topology: v5e:2x2
jax: 0.10.0
libtpu: 0.0.40
codegen_flags: <defaults>
</compile_context>

<pallas_src>
import math
import functools

import jax
import jax.numpy as jnp
from jax.experimental import pallas as pl
from jax.experimental.pallas import tpu as pltpu


_LN_EPS = 1e-5  # PyTorch nn.LayerNorm default


def _layer_norm(x, gamma, beta, eps=_LN_EPS):
    mu = jnp.mean(x, axis=-1, keepdims=True)
    xc = x - mu
    var = jnp.mean(xc * xc, axis=-1, keepdims=True)
    return xc * jax.lax.rsqrt(var + eps) * gamma + beta


def _gelu_tanh(x):
    c = math.sqrt(2.0 / math.pi)
    return 0.5 * x * (1.0 + jnp.tanh(c * (x + 0.044715 * x * x * x)))


def _transformer_block_kernel(
        x_ref,
        ln1_g_ref, ln1_b_ref,
        wqkv_ref, bqkv_ref,
        wo_ref, bo_ref,
        ln2_g_ref, ln2_b_ref,
        w1_ref, b1_ref,
        w2_ref, b2_ref,
        o_ref,
        ctx_ref,                      # (S, D) f32 VMEM scratch: per-head contexts
        *, num_heads, q_tile):
    f32, bf16 = jnp.float32, jnp.bfloat16
    x = x_ref[0].astype(f32)                        # (S, D) — one batch element
    S, D = x.shape
    hd = D // num_heads
    scale = 1.0 / math.sqrt(hd)

    # ---- pre-LN 1 + fused QKV projection (one wide MXU pass) ----
    h = _layer_norm(x, ln1_g_ref[...], ln1_b_ref[...]).astype(bf16)
    qkv = jnp.dot(h, wqkv_ref[...], preferred_element_type=f32) + bqkv_ref[...]
    q = qkv[:, 0 * D:1 * D].astype(bf16)
    k = qkv[:, 1 * D:2 * D].astype(bf16)
    v = qkv[:, 2 * D:3 * D].astype(bf16)

    # ---- per-head attention; q tiled so live scores are (q_tile, S) ----
    for hh in range(num_heads):                     # small static loop
        lo = hh * hd
        kh = k[:, lo:lo + hd]                       # (S, hd) bf16
        vh = v[:, lo:lo + hd]                       # (S, hd) bf16
        for q0 in range(0, S, q_tile):
            tq = min(q_tile, S - q0)
            qh = q[q0:q0 + tq, lo:lo + hd]          # (tq, hd) bf16
            # scores = qh @ kh^T (contract last dim of both, no transpose)
            s = jax.lax.dot_general(
                qh, kh, (((1,), (1,)), ((), ())),
                preferred_element_type=f32) * scale            # (tq, S)
            s = s - jnp.max(s, axis=-1, keepdims=True)
            p = jnp.exp(s)
            p = p * pl.reciprocal(jnp.sum(p, axis=-1, keepdims=True), approx=True)
            oh = jnp.dot(p.astype(bf16), vh, preferred_element_type=f32)
            ctx_ref[q0:q0 + tq, lo:lo + hd] = oh    # bound live ranges per head

    # ---- single full-K output projection + residual 1 ----
    attn = jnp.dot(ctx_ref[...].astype(bf16), wo_ref[...],
                   preferred_element_type=f32) + bo_ref[...]
    x1 = x + attn

    # ---- pre-LN 2 + MLP + residual 2 ----
    h2 = _layer_norm(x1, ln2_g_ref[...], ln2_b_ref[...]).astype(bf16)
    m = jnp.dot(h2, w1_ref[...], preferred_element_type=f32) + b1_ref[...]
    m = _gelu_tanh(m).astype(bf16)
    m = jnp.dot(m, w2_ref[...], preferred_element_type=f32) + b2_ref[...]

    o_ref[0] = (x1 + m).astype(o_ref.dtype)


def _vmem_limit_bytes(S, D, M, q_tile):
    """Per-step VMEM footprint estimate with headroom (weights double-buffered)."""
    act = 2 * 2 * S * D * 4                                   # x/out tiles, 2 bufs
    weights = 2 * 2 * (3 * D * D + D * D + D * M + M * D)     # bf16, 2 bufs
    small = 2 * 4 * (3 * D + D + M + D + 4 * D)               # biases + LN params
    inter = 4 * (3 * S * D + 3 * S * D + min(S, q_tile) * S + S * M) + 4 * S * D
    est = act + weights + small + inter
    # Cap at 128 MiB (v5e/v6e physical); on v7x one would cap lower (~56 MiB).
    return int(min(128 << 20, max(32 << 20, 2 * est + (8 << 20))))


def transformer_block(x, params, *, num_heads, q_tile=256):
    """x: (B, S, D) float32 -> (B, S, D). Whole block in one pallas_call."""
    B, S, D = x.shape
    M = params["w1_t"].shape[1]
    assert D % num_heads == 0
    q_tile = min(q_tile, S)

    kernel = functools.partial(_transformer_block_kernel,
                               num_heads=num_heads, q_tile=q_tile)

    act_map = lambda b: (b, 0, 0)          # per-batch activation tile
    const2d = lambda b: (0, 0)             # weights: constant block, stays in VMEM

    in_specs = [
        pl.BlockSpec((1, S, D), act_map),                                   # x
        pl.BlockSpec((1, D), const2d), pl.BlockSpec((1, D), const2d),       # LN1 g,b
        pl.BlockSpec((D, 3 * D), const2d), pl.BlockSpec((1, 3 * D), const2d),  # Wqkv^T, bqkv
        pl.BlockSpec((D, D), const2d), pl.BlockSpec((1, D), const2d),       # Wo^T, bo
        pl.BlockSpec((1, D), const2d), pl.BlockSpec((1, D), const2d),       # LN2 g,b
        pl.BlockSpec((D, M), const2d), pl.BlockSpec((1, M), const2d),       # W1^T, b1
        pl.BlockSpec((M, D), const2d), pl.BlockSpec((1, D), const2d),       # W2^T, b2
    ]
    out_specs = pl.BlockSpec((1, S, D), act_map)

    # Advisory cost estimate: qkv + out proj + attention + MLP.
    flops = B * (8 * S * D * D + 4 * S * S * D + 4 * S * D * M)
    transcendentals = B * (num_heads * S * S + S * M + 2 * S)
    param_bytes = 2 * (4 * D * D + 2 * D * M) + 4 * (7 * D + M)
    bytes_accessed = 2 * B * S * D * 4 + param_bytes

    return pl.pallas_call(
        kernel,
        out_shape=jax.ShapeDtypeStruct((B, S, D), x.dtype),
        grid_spec=pltpu.PrefetchScalarGridSpec(
            num_scalar_prefetch=0,
            grid=(B,),
            in_specs=in_specs,
            out_specs=out_specs,
            scratch_shapes=[pltpu.VMEM((S, D), jnp.float32)],
        ),
        compiler_params=pltpu.CompilerParams(
            dimension_semantics=("parallel",),
            vmem_limit_bytes=_vmem_limit_bytes(S, D, M, q_tile)),
        cost_estimate=pl.CostEstimate(
            flops=flops, transcendentals=transcendentals,
            bytes_accessed=bytes_accessed),
    )(x,
      params["ln1_g"], params["ln1_b"],
      params["wqkv_t"], params["bqkv"],
      params["wo_t"], params["bo"],
      params["ln2_g"], params["ln2_b"],
      params["w1_t"], params["b1"], params["w2_t"], params["b2"])


def init_params(key, dim, mlp_dim):
    """Matmul weights stored PRE-TRANSPOSED (in_features, out_features) in bf16."""
    keys = jax.random.split(key, 8)
    bf16 = jnp.bfloat16

    def unif(k, shape, fan_in, dtype=jnp.float32):
        bound = 1.0 / math.sqrt(fan_in)
        return jax.random.uniform(k, shape, jnp.float32, -bound, bound).astype(dtype)

    return dict(
        ln1_g=jnp.ones((1, dim), jnp.float32),
        ln1_b=jnp.zeros((1, dim), jnp.float32),
        wqkv_t=unif(keys[0], (dim, 3 * dim), dim, bf16),   # fused in_proj (like PyTorch MHA)
        bqkv=unif(keys[1], (1, 3 * dim), dim),
        wo_t=unif(keys[2], (dim, dim), dim, bf16),
        bo=unif(keys[3], (1, dim), dim),
        ln2_g=jnp.ones((1, dim), jnp.float32),
        ln2_b=jnp.zeros((1, dim), jnp.float32),
        w1_t=unif(keys[4], (dim, mlp_dim), dim, bf16),
        b1=unif(keys[5], (1, mlp_dim), dim),
        w2_t=unif(keys[6], (mlp_dim, dim), mlp_dim, bf16),
        b2=unif(keys[7], (1, dim), mlp_dim),
    )


def transformer_block_ref(x, p, *, num_heads):
    """Plain-JAX reference with the same bf16-operand / f32-accumulate math."""
    f32, bf16 = jnp.float32, jnp.bfloat16
    B, S, D = x.shape
    hd = D // num_heads

    h = _layer_norm(x, p["ln1_g"], p["ln1_b"])
    qkv = jnp.einsum("bsd,de->bse", h.astype(bf16), p["wqkv_t"],
                     preferred_element_type=f32) + p["bqkv"]
    q, k, v = qkv[..., :D], qkv[..., D:2 * D], qkv[..., 2 * D:]
    q = q.reshape(B, S, num_heads, hd).astype(bf16)
    k = k.reshape(B, S, num_heads, hd).astype(bf16)
    v = v.reshape(B, S, num_heads, hd).astype(bf16)
    s = jnp.einsum("bqhe,bkhe->bhqk", q, k,
                   preferred_element_type=f32) / math.sqrt(hd)
    a = jax.nn.softmax(s, axis=-1)
    ctx = jnp.einsum("bhqk,bkhe->bqhe", a.astype(bf16), v,
                     preferred_element_type=f32).reshape(B, S, D)
    attn = jnp.einsum("bsd,de->bse", ctx.astype(bf16), p["wo_t"],
                      preferred_element_type=f32) + p["bo"]
    x1 = x + attn
    h2 = _layer_norm(x1, p["ln2_g"], p["ln2_b"])
    m = jnp.einsum("bsd,dm->bsm", h2.astype(bf16), p["w1_t"],
                   preferred_element_type=f32) + p["b1"]
    m = _gelu_tanh(m)
    m = jnp.einsum("bsm,md->bsd", m.astype(bf16), p["w2_t"],
                   preferred_element_type=f32) + p["b2"]
    return x1 + m


if __name__ == "__main__":
    key = jax.random.PRNGKey(0)
    k_x, k_p = jax.random.split(key)

    # Small but lane-friendly config: S multiple of 8, D/M multiples of 128.
    B, S, D, H, M = 2, 8, 128, 4, 256

    x = jax.random.normal(k_x, (B, S, D), jnp.float32)
    params = init_params(k_p, D, M)

    out = transformer_block(x, params, num_heads=H)
    out = jax.block_until_ready(out)

    ref = transformer_block_ref(x, params, num_heads=H)
    assert out.shape == (B, S, D)
    err = float(jnp.max(jnp.abs(out - ref)))
    assert err < 2e-2, f"mismatch vs reference: max abs err {err}"

    print("KERNEL_OK")
</pallas_src>

<mosaic_0001>
module attributes {stable_mosaic.version = 11 : i64} {
  func.func @_transformer_block_kernel(%arg0: i32, %arg1: memref<1x8x128xf32, #tpu.memory_space<vmem>>, %arg2: memref<1x128xf32, #tpu.memory_space<vmem>>, %arg3: memref<1x128xf32, #tpu.memory_space<vmem>>, %arg4: memref<128x384xbf16, #tpu.memory_space<vmem>>, %arg5: memref<1x384xf32, #tpu.memory_space<vmem>>, %arg6: memref<128x128xbf16, #tpu.memory_space<vmem>>, %arg7: memref<1x128xf32, #tpu.memory_space<vmem>>, %arg8: memref<1x128xf32, #tpu.memory_space<vmem>>, %arg9: memref<1x128xf32, #tpu.memory_space<vmem>>, %arg10: memref<128x256xbf16, #tpu.memory_space<vmem>>, %arg11: memref<1x256xf32, #tpu.memory_space<vmem>>, %arg12: memref<256x128xbf16, #tpu.memory_space<vmem>>, %arg13: memref<1x128xf32, #tpu.memory_space<vmem>>, %arg14: memref<1x8x128xf32, #tpu.memory_space<vmem>>, %arg15: memref<8x128xf32, #tpu.memory_space<vmem>>) attributes {dimension_semantics = [#tpu.dimension_semantics<parallel>], iteration_bounds = array<i64: 2>, scalar_prefetch = 0 : i64, scratch_operands = 1 : i64, tpu.core_type = #tpu.core_type<tc>, window_params = [{transform_indices = @transform_0, window_bounds = array<i64: 1, 8, 128>}, {pipeline_mode = #tpu.pipeline_mode<synchronous>, transform_indices = @transform_1, window_bounds = array<i64: 1, 128>}, {pipeline_mode = #tpu.pipeline_mode<synchronous>, transform_indices = @transform_2, window_bounds = array<i64: 1, 128>}, {pipeline_mode = #tpu.pipeline_mode<synchronous>, transform_indices = @transform_3, window_bounds = array<i64: 128, 384>}, {pipeline_mode = #tpu.pipeline_mode<synchronous>, transform_indices = @transform_4, window_bounds = array<i64: 1, 384>}, {pipeline_mode = #tpu.pipeline_mode<synchronous>, transform_indices = @transform_5, window_bounds = array<i64: 128, 128>}, {pipeline_mode = #tpu.pipeline_mode<synchronous>, transform_indices = @transform_6, window_bounds = array<i64: 1, 128>}, {pipeline_mode = #tpu.pipeline_mode<synchronous>, transform_indices = @transform_7, window_bounds = array<i64: 1, 128>}, {pipeline_mode = #tpu.pipeline_mode<synchronous>, transform_indices = @transform_8, window_bounds = array<i64: 1, 128>}, {pipeline_mode = #tpu.pipeline_mode<synchronous>, transform_indices = @transform_9, window_bounds = array<i64: 128, 256>}, {pipeline_mode = #tpu.pipeline_mode<synchronous>, transform_indices = @transform_10, window_bounds = array<i64: 1, 256>}, {pipeline_mode = #tpu.pipeline_mode<synchronous>, transform_indices = @transform_11, window_bounds = array<i64: 256, 128>}, {pipeline_mode = #tpu.pipeline_mode<synchronous>, transform_indices = @transform_12, window_bounds = array<i64: 1, 128>}, {transform_indices = @transform_13, window_bounds = array<i64: 1, 8, 128>}]} {
    %c0 = arith.constant 0 : index
    %c0_0 = arith.constant 0 : index
    %c0_1 = arith.constant 0 : index
    %0 = vector.load %arg1[%c0, %c0_0, %c0_1] : memref<1x8x128xf32, #tpu.memory_space<vmem>>, vector<1x8x128xf32>
    %1 = vector.shape_cast %0 : vector<1x8x128xf32> to vector<8x128xf32>
    %c0_2 = arith.constant 0 : index
    %c0_3 = arith.constant 0 : index
    %2 = vector.load %arg2[%c0_2, %c0_3] : memref<1x128xf32, #tpu.memory_space<vmem>>, vector<1x128xf32>
    %c0_4 = arith.constant 0 : index
    %c0_5 = arith.constant 0 : index
    %3 = vector.load %arg3[%c0_4, %c0_5] : memref<1x128xf32, #tpu.memory_space<vmem>>, vector<1x128xf32>
    %cst = arith.constant dense<0.000000e+00> : vector<8xf32>
    %4 = vector.multi_reduction <add>, %1, %cst [1] : vector<8x128xf32> to vector<8xf32>
    %5 = vector.shape_cast %4 : vector<8xf32> to vector<8x1xf32>
    %cst_6 = arith.constant 1.280000e+02 : f32
    %6 = vector.broadcast %cst_6 : f32 to vector<8x1xf32>
    %7 = arith.divf %5, %6 : vector<8x1xf32>
    %8 = vector.broadcast %7 : vector<8x1xf32> to vector<8x128xf32>
    %9 = arith.subf %1, %8 : vector<8x128xf32>
    %10 = arith.mulf %9, %9 : vector<8x128xf32>
    %cst_7 = arith.constant dense<0.000000e+00> : vector<8xf32>
    %11 = vector.multi_reduction <add>, %10, %cst_7 [1] : vector<8x128xf32> to vector<8xf32>
    %12 = vector.shape_cast %11 : vector<8xf32> to vector<8x1xf32>
    %cst_8 = arith.constant 1.280000e+02 : f32
    %13 = vector.broadcast %cst_8 : f32 to vector<8x1xf32>
    %14 = arith.divf %12, %13 : vector<8x1xf32>
    %cst_9 = arith.constant 9.99999974E-6 : f32
    %15 = vector.broadcast %cst_9 : f32 to vector<8x1xf32>
    %16 = arith.addf %14, %15 : vector<8x1xf32>
    %17 = math.rsqrt %16 : vector<8x1xf32>
    %18 = vector.broadcast %17 : vector<8x1xf32> to vector<8x128xf32>
    %19 = arith.mulf %9, %18 : vector<8x128xf32>
    %20 = vector.broadcast %2 : vector<1x128xf32> to vector<8x128xf32>
    %21 = arith.mulf %19, %20 : vector<8x128xf32>
    %22 = vector.broadcast %3 : vector<1x128xf32> to vector<8x128xf32>
    %23 = arith.addf %21, %22 : vector<8x128xf32>
    %24 = arith.truncf %23 : vector<8x128xf32> to vector<8x128xbf16>
    %c0_10 = arith.constant 0 : index
    %c0_11 = arith.constant 0 : index
    %25 = vector.load %arg4[%c0_10, %c0_11] : memref<128x384xbf16, #tpu.memory_space<vmem>>, vector<128x384xbf16>
    %cst_12 = arith.constant dense<0.000000e+00> : vector<8x384xf32>
    %26 = tpu.matmul %24, %25, %cst_12 {dimension_numbers = #tpu.dot_dimension_numbers<[1], [0], [0], [1], [0, 0, 1, 1], [], []>} : vector<8x128xbf16>, vector<128x384xbf16>, vector<8x384xf32> -> vector<8x384xf32>
    %c0_13 = arith.constant 0 : index
    %c0_14 = arith.constant 0 : index
    %27 = vector.load %arg5[%c0_13, %c0_14] : memref<1x384xf32, #tpu.memory_space<vmem>>, vector<1x384xf32>
    %28 = vector.broadcast %27 : vector<1x384xf32> to vector<8x384xf32>
    %29 = arith.addf %26, %28 : vector<8x384xf32>
    %30 = vector.extract_strided_slice %29 {offsets = [0, 0], sizes = [8, 128], strides = [1, 1]} : vector<8x384xf32> to vector<8x128xf32>
    %31 = arith.truncf %30 : vector<8x128xf32> to vector<8x128xbf16>
    %32 = vector.extract_strided_slice %29 {offsets = [0, 128], sizes = [8, 128], strides = [1, 1]} : vector<8x384xf32> to vector<8x128xf32>
    %33 = arith.truncf %32 : vector<8x128xf32> to vector<8x128xbf16>
    %34 = vector.extract_strided_slice %29 {offsets = [0, 256], sizes = [8, 128], strides = [1, 1]} : vector<8x384xf32> to vector<8x128xf32>
    %35 = arith.truncf %34 : vector<8x128xf32> to vector<8x128xbf16>
    %36 = vector.extract_strided_slice %33 {offsets = [0, 0], sizes = [8, 32], strides = [1, 1]} : vector<8x128xbf16> to vector<8x32xbf16>
    %37 = vector.extract_strided_slice %35 {offsets = [0, 0], sizes = [8, 32], strides = [1, 1]} : vector<8x128xbf16> to vector<8x32xbf16>
    %38 = vector.extract_strided_slice %31 {offsets = [0, 0], sizes = [8, 32], strides = [1, 1]} : vector<8x128xbf16> to vector<8x32xbf16>
    %cst_15 = arith.constant dense<0.000000e+00> : vector<8x8xf32>
    %39 = tpu.matmul %38, %36, %cst_15 {dimension_numbers = #tpu.dot_dimension_numbers<[1], [1], [0], [0], [0, 0, 1, 0], [], []>} : vector<8x32xbf16>, vector<8x32xbf16>, vector<8x8xf32> -> vector<8x8xf32>
    %cst_16 = arith.constant 0.176776692 : f32
    %40 = vector.broadcast %cst_16 : f32 to vector<8x8xf32>
    %41 = arith.mulf %39, %40 : vector<8x8xf32>
    %cst_17 = arith.constant dense<0xFF800000> : vector<8xf32>
    %42 = vector.multi_reduction <maximumf>, %41, %cst_17 [1] : vector<8x8xf32> to vector<8xf32>
    %43 = vector.shape_cast %42 : vector<8xf32> to vector<8x1xf32>
    %44 = vector.broadcast %43 : vector<8x1xf32> to vector<8x8xf32>
    %45 = arith.subf %41, %44 : vector<8x8xf32>
    %46 = math.exp %45 : vector<8x8xf32>
    %cst_18 = arith.constant dense<0.000000e+00> : vector<8xf32>
    %47 = vector.multi_reduction <add>, %46, %cst_18 [1] : vector<8x8xf32> to vector<8xf32>
    %48 = vector.shape_cast %47 : vector<8xf32> to vector<8x1xf32>
    %49 = tpu.reciprocal %48 {approx = true} : vector<8x1xf32> -> vector<8x1xf32>
    %50 = vector.broadcast %49 : vector<8x1xf32> to vector<8x8xf32>
    %51 = arith.mulf %46, %50 : vector<8x8xf32>
    %52 = arith.truncf %51 : vector<8x8xf32> to vector<8x8xbf16>
    %cst_19 = arith.constant dense<0.000000e+00> : vector<8x32xf32>
    %53 = tpu.matmul %52, %37, %cst_19 {dimension_numbers = #tpu.dot_dimension_numbers<[1], [0], [0], [1], [0, 0, 1, 1], [], []>} : vector<8x8xbf16>, vector<8x32xbf16>, vector<8x32xf32> -> vector<8x32xf32>
    %c0_20 = arith.constant 0 : index
    %c0_21 = arith.constant 0 : index
    %54 = vector.load %arg15[%c0_20, %c0_21] : memref<8x128xf32, #tpu.memory_space<vmem>>, vector<8x32xf32>
    tpu.vector_store %arg15[%c0_20, %c0_21], %53 {strides = array<i32>} : memref<8x128xf32, #tpu.memory_space<vmem>>, vector<8x32xf32>,
    %55 = vector.extract_strided_slice %33 {offsets = [0, 32], sizes = [8, 32], strides = [1, 1]} : vector<8x128xbf16> to vector<8x32xbf16>
    %56 = vector.extract_strided_slice %35 {offsets = [0, 32], sizes = [8, 32], strides = [1, 1]} : vector<8x128xbf16> to vector<8x32xbf16>
    %57 = vector.extract_strided_slice %31 {offsets = [0, 32], sizes = [8, 32], strides = [1, 1]} : vector<8x128xbf16> to vector<8x32xbf16>
    %cst_22 = arith.constant dense<0.000000e+00> : vector<8x8xf32>
    %58 = tpu.matmul %57, %55, %cst_22 {dimension_numbers = #tpu.dot_dimension_numbers<[1], [1], [0], [0], [0, 0, 1, 0], [], []>} : vector<8x32xbf16>, vector<8x32xbf16>, vector<8x8xf32> -> vector<8x8xf32>
    %cst_23 = arith.constant 0.176776692 : f32
    %59 = vector.broadcast %cst_23 : f32 to vector<8x8xf32>
    %60 = arith.mulf %58, %59 : vector<8x8xf32>
    %cst_24 = arith.constant dense<0xFF800000> : vector<8xf32>
    %61 = vector.multi_reduction <maximumf>, %60, %cst_24 [1] : vector<8x8xf32> to vector<8xf32>
    %62 = vector.shape_cast %61 : vector<8xf32> to vector<8x1xf32>
    %63 = vector.broadcast %62 : vector<8x1xf32> to vector<8x8xf32>
    %64 = arith.subf %60, %63 : vector<8x8xf32>
    %65 = math.exp %64 : vector<8x8xf32>
    %cst_25 = arith.constant dense<0.000000e+00> : vector<8xf32>
    %66 = vector.multi_reduction <add>, %65, %cst_25 [1] : vector<8x8xf32> to vector<8xf32>
    %67 = vector.shape_cast %66 : vector<8xf32> to vector<8x1xf32>
    %68 = tpu.reciprocal %67 {approx = true} : vector<8x1xf32> -> vector<8x1xf32>
    %69 = vector.broadcast %68 : vector<8x1xf32> to vector<8x8xf32>
    %70 = arith.mulf %65, %69 : vector<8x8xf32>
    %71 = arith.truncf %70 : vector<8x8xf32> to vector<8x8xbf16>
    %cst_26 = arith.constant dense<0.000000e+00> : vector<8x32xf32>
    %72 = tpu.matmul %71, %56, %cst_26 {dimension_numbers = #tpu.dot_dimension_numbers<[1], [0], [0], [1], [0, 0, 1, 1], [], []>} : vector<8x8xbf16>, vector<8x32xbf16>, vector<8x32xf32> -> vector<8x32xf32>
    %c0_27 = arith.constant 0 : index
    %c32 = arith.constant 32 : index
    %73 = vector.load %arg15[%c0_27, %c32] : memref<8x128xf32, #tpu.memory_space<vmem>>, vector<8x32xf32>
    tpu.vector_store %arg15[%c0_27, %c32], %72 {strides = array<i32>} : memref<8x128xf32, #tpu.memory_space<vmem>>, vector<8x32xf32>,
    %74 = vector.extract_strided_slice %33 {offsets = [0, 64], sizes = [8, 32], strides = [1, 1]} : vector<8x128xbf16> to vector<8x32xbf16>
    %75 = vector.extract_strided_slice %35 {offsets = [0, 64], sizes = [8, 32], strides = [1, 1]} : vector<8x128xbf16> to vector<8x32xbf16>
    %76 = vector.extract_strided_slice %31 {offsets = [0, 64], sizes = [8, 32], strides = [1, 1]} : vector<8x128xbf16> to vector<8x32xbf16>
    %cst_28 = arith.constant dense<0.000000e+00> : vector<8x8xf32>
    %77 = tpu.matmul %76, %74, %cst_28 {dimension_numbers = #tpu.dot_dimension_numbers<[1], [1], [0], [0], [0, 0, 1, 0], [], []>} : vector<8x32xbf16>, vector<8x32xbf16>, vector<8x8xf32> -> vector<8x8xf32>
    %cst_29 = arith.constant 0.176776692 : f32
    %78 = vector.broadcast %cst_29 : f32 to vector<8x8xf32>
    %79 = arith.mulf %77, %78 : vector<8x8xf32>
    %cst_30 = arith.constant dense<0xFF800000> : vector<8xf32>
    %80 = vector.multi_reduction <maximumf>, %79, %cst_30 [1] : vector<8x8xf32> to vector<8xf32>
    %81 = vector.shape_cast %80 : vector<8xf32> to vector<8x1xf32>
    %82 = vector.broadcast %81 : vector<8x1xf32> to vector<8x8xf32>
    %83 = arith.subf %79, %82 : vector<8x8xf32>
    %84 = math.exp %83 : vector<8x8xf32>
    %cst_31 = arith.constant dense<0.000000e+00> : vector<8xf32>
    %85 = vector.multi_reduction <add>, %84, %cst_31 [1] : vector<8x8xf32> to vector<8xf32>
    %86 = vector.shape_cast %85 : vector<8xf32> to vector<8x1xf32>
    %87 = tpu.reciprocal %86 {approx = true} : vector<8x1xf32> -> vector<8x1xf32>
    %88 = vector.broadcast %87 : vector<8x1xf32> to vector<8x8xf32>
    %89 = arith.mulf %84, %88 : vector<8x8xf32>
    %90 = arith.truncf %89 : vector<8x8xf32> to vector<8x8xbf16>
    %cst_32 = arith.constant dense<0.000000e+00> : vector<8x32xf32>
    %91 = tpu.matmul %90, %75, %cst_32 {dimension_numbers = #tpu.dot_dimension_numbers<[1], [0], [0], [1], [0, 0, 1, 1], [], []>} : vector<8x8xbf16>, vector<8x32xbf16>, vector<8x32xf32> -> vector<8x32xf32>
    %c0_33 = arith.constant 0 : index
    %c64 = arith.constant 64 : index
    %92 = vector.load %arg15[%c0_33, %c64] : memref<8x128xf32, #tpu.memory_space<vmem>>, vector<8x32xf32>
    tpu.vector_store %arg15[%c0_33, %c64], %91 {strides = array<i32>} : memref<8x128xf32, #tpu.memory_space<vmem>>, vector<8x32xf32>,
    %93 = vector.extract_strided_slice %33 {offsets = [0, 96], sizes = [8, 32], strides = [1, 1]} : vector<8x128xbf16> to vector<8x32xbf16>
    %94 = vector.extract_strided_slice %35 {offsets = [0, 96], sizes = [8, 32], strides = [1, 1]} : vector<8x128xbf16> to vector<8x32xbf16>
    %95 = vector.extract_strided_slice %31 {offsets = [0, 96], sizes = [8, 32], strides = [1, 1]} : vector<8x128xbf16> to vector<8x32xbf16>
    %cst_34 = arith.constant dense<0.000000e+00> : vector<8x8xf32>
    %96 = tpu.matmul %95, %93, %cst_34 {dimension_numbers = #tpu.dot_dimension_numbers<[1], [1], [0], [0], [0, 0, 1, 0], [], []>} : vector<8x32xbf16>, vector<8x32xbf16>, vector<8x8xf32> -> vector<8x8xf32>
    %cst_35 = arith.constant 0.176776692 : f32
    %97 = vector.broadcast %cst_35 : f32 to vector<8x8xf32>
    %98 = arith.mulf %96, %97 : vector<8x8xf32>
    %cst_36 = arith.constant dense<0xFF800000> : vector<8xf32>
    %99 = vector.multi_reduction <maximumf>, %98, %cst_36 [1] : vector<8x8xf32> to vector<8xf32>
    %100 = vector.shape_cast %99 : vector<8xf32> to vector<8x1xf32>
    %101 = vector.broadcast %100 : vector<8x1xf32> to vector<8x8xf32>
    %102 = arith.subf %98, %101 : vector<8x8xf32>
    %103 = math.exp %102 : vector<8x8xf32>
    %cst_37 = arith.constant dense<0.000000e+00> : vector<8xf32>
    %104 = vector.multi_reduction <add>, %103, %cst_37 [1] : vector<8x8xf32> to vector<8xf32>
    %105 = vector.shape_cast %104 : vector<8xf32> to vector<8x1xf32>
    %106 = tpu.reciprocal %105 {approx = true} : vector<8x1xf32> -> vector<8x1xf32>
    %107 = vector.broadcast %106 : vector<8x1xf32> to vector<8x8xf32>
    %108 = arith.mulf %103, %107 : vector<8x8xf32>
    %109 = arith.truncf %108 : vector<8x8xf32> to vector<8x8xbf16>
    %cst_38 = arith.constant dense<0.000000e+00> : vector<8x32xf32>
    %110 = tpu.matmul %109, %94, %cst_38 {dimension_numbers = #tpu.dot_dimension_numbers<[1], [0], [0], [1], [0, 0, 1, 1], [], []>} : vector<8x8xbf16>, vector<8x32xbf16>, vector<8x32xf32> -> vector<8x32xf32>
    %c0_39 = arith.constant 0 : index
    %c96 = arith.constant 96 : index
    %111 = vector.load %arg15[%c0_39, %c96] : memref<8x128xf32, #tpu.memory_space<vmem>>, vector<8x32xf32>
    tpu.vector_store %arg15[%c0_39, %c96], %110 {strides = array<i32>} : memref<8x128xf32, #tpu.memory_space<vmem>>, vector<8x32xf32>,
    %c0_40 = arith.constant 0 : index
    %c0_41 = arith.constant 0 : index
    %112 = vector.load %arg15[%c0_40, %c0_41] : memref<8x128xf32, #tpu.memory_space<vmem>>, vector<8x128xf32>
    %113 = arith.truncf %112 : vector<8x128xf32> to vector<8x128xbf16>
    %c0_42 = arith.constant 0 : index
    %c0_43 = arith.constant 0 : index
    %114 = vector.load %arg6[%c0_42, %c0_43] : memref<128x128xbf16, #tpu.memory_space<vmem>>, vector<128x128xbf16>
    %cst_44 = arith.constant dense<0.000000e+00> : vector<8x128xf32>
    %115 = tpu.matmul %113, %114, %cst_44 {dimension_numbers = #tpu.dot_dimension_numbers<[1], [0], [0], [1], [0, 0, 1, 1], [], []>} : vector<8x128xbf16>, vector<128x128xbf16>, vector<8x128xf32> -> vector<8x128xf32>
    %c0_45 = arith.constant 0 : index
    %c0_46 = arith.constant 0 : index
    %116 = vector.load %arg7[%c0_45, %c0_46] : memref<1x128xf32, #tpu.memory_space<vmem>>, vector<1x128xf32>
    %117 = vector.broadcast %116 : vector<1x128xf32> to vector<8x128xf32>
    %118 = arith.addf %115, %117 : vector<8x128xf32>
    %119 = arith.addf %1, %118 : vector<8x128xf32>
    %c0_47 = arith.constant 0 : index
    %c0_48 = arith.constant 0 : index
    %120 = vector.load %arg8[%c0_47, %c0_48] : memref<1x128xf32, #tpu.memory_space<vmem>>, vector<1x128xf32>
    %c0_49 = arith.constant 0 : index
    %c0_50 = arith.constant 0 : index
    %121 = vector.load %arg9[%c0_49, %c0_50] : memref<1x128xf32, #tpu.memory_space<vmem>>, vector<1x128xf32>
    %cst_51 = arith.constant dense<0.000000e+00> : vector<8xf32>
    %122 = vector.multi_reduction <add>, %119, %cst_51 [1] : vector<8x128xf32> to vector<8xf32>
    %123 = vector.shape_cast %122 : vector<8xf32> to vector<8x1xf32>
    %cst_52 = arith.constant 1.280000e+02 : f32
    %124 = vector.broadcast %cst_52 : f32 to vector<8x1xf32>
    %125 = arith.divf %123, %124 : vector<8x1xf32>
    %126 = vector.broadcast %125 : vector<8x1xf32> to vector<8x128xf32>
    %127 = arith.subf %119, %126 : vector<8x128xf32>
    %128 = arith.mulf %127, %127 : vector<8x128xf32>
    %cst_53 = arith.constant dense<0.000000e+00> : vector<8xf32>
    %129 = vector.multi_reduction <add>, %128, %cst_53 [1] : vector<8x128xf32> to vector<8xf32>
    %130 = vector.shape_cast %129 : vector<8xf32> to vector<8x1xf32>
    %cst_54 = arith.constant 1.280000e+02 : f32
    %131 = vector.broadcast %cst_54 : f32 to vector<8x1xf32>
    %132 = arith.divf %130, %131 : vector<8x1xf32>
    %cst_55 = arith.constant 9.99999974E-6 : f32
    %133 = vector.broadcast %cst_55 : f32 to vector<8x1xf32>
    %134 = arith.addf %132, %133 : vector<8x1xf32>
    %135 = math.rsqrt %134 : vector<8x1xf32>
    %136 = vector.broadcast %135 : vector<8x1xf32> to vector<8x128xf32>
    %137 = arith.mulf %127, %136 : vector<8x128xf32>
    %138 = vector.broadcast %120 : vector<1x128xf32> to vector<8x128xf32>
    %139 = arith.mulf %137, %138 : vector<8x128xf32>
    %140 = vector.broadcast %121 : vector<1x128xf32> to vector<8x128xf32>
    %141 = arith.addf %139, %140 : vector<8x128xf32>
    %142 = arith.truncf %141 : vector<8x128xf32> to vector<8x128xbf16>
    %c0_56 = arith.constant 0 : index
    %c0_57 = arith.constant 0 : index
    %143 = vector.load %arg10[%c0_56, %c0_57] : memref<128x256xbf16, #tpu.memory_space<vmem>>, vector<128x256xbf16>
    %cst_58 = arith.constant dense<0.000000e+00> : vector<8x256xf32>
    %144 = tpu.matmul %142, %143, %cst_58 {dimension_numbers = #tpu.dot_dimension_numbers<[1], [0], [0], [1], [0, 0, 1, 1], [], []>} : vector<8x128xbf16>, vector<128x256xbf16>, vector<8x256xf32> -> vector<8x256xf32>
    %c0_59 = arith.constant 0 : index
    %c0_60 = arith.constant 0 : index
    %145 = vector.load %arg11[%c0_59, %c0_60] : memref<1x256xf32, #tpu.memory_space<vmem>>, vector<1x256xf32>
    %146 = vector.broadcast %145 : vector<1x256xf32> to vector<8x256xf32>
    %147 = arith.addf %144, %146 : vector<8x256xf32>
    %cst_61 = arith.constant 5.000000e-01 : f32
    %148 = vector.broadcast %cst_61 : f32 to vector<8x256xf32>
    %149 = arith.mulf %148, %147 : vector<8x256xf32>
    %cst_62 = arith.constant 4.471500e-02 : f32
    %150 = vector.broadcast %cst_62 : f32 to vector<8x256xf32>
    %151 = arith.mulf %150, %147 : vector<8x256xf32>
    %152 = arith.mulf %151, %147 : vector<8x256xf32>
    %153 = arith.mulf %152, %147 : vector<8x256xf32>
    %154 = arith.addf %147, %153 : vector<8x256xf32>
    %cst_63 = arith.constant 0.797884583 : f32
    %155 = vector.broadcast %cst_63 : f32 to vector<8x256xf32>
    %156 = arith.mulf %155, %154 : vector<8x256xf32>
    %157 = math.tanh %156 : vector<8x256xf32>
    %cst_64 = arith.constant 1.000000e+00 : f32
    %158 = vector.broadcast %cst_64 : f32 to vector<8x256xf32>
    %159 = arith.addf %158, %157 : vector<8x256xf32>
    %160 = arith.mulf %149, %159 : vector<8x256xf32>
    %161 = arith.truncf %160 : vector<8x256xf32> to vector<8x256xbf16>
    %c0_65 = arith.constant 0 : index
    %c0_66 = arith.constant 0 : index
    %162 = vector.load %arg12[%c0_65, %c0_66] : memref<256x128xbf16, #tpu.memory_space<vmem>>, vector<256x128xbf16>
    %cst_67 = arith.constant dense<0.000000e+00> : vector<8x128xf32>
    %163 = tpu.matmul %161, %162, %cst_67 {dimension_numbers = #tpu.dot_dimension_numbers<[1], [0], [0], [1], [0, 0, 1, 1], [], []>} : vector<8x256xbf16>, vector<256x128xbf16>, vector<8x128xf32> -> vector<8x128xf32>
    %c0_68 = arith.constant 0 : index
    %c0_69 = arith.constant 0 : index
    %164 = vector.load %arg13[%c0_68, %c0_69] : memref<1x128xf32, #tpu.memory_space<vmem>>, vector<1x128xf32>
    %165 = vector.broadcast %164 : vector<1x128xf32> to vector<8x128xf32>
    %166 = arith.addf %163, %165 : vector<8x128xf32>
    %167 = arith.addf %119, %166 : vector<8x128xf32>
    %c0_70 = arith.constant 0 : index
    %c0_71 = arith.constant 0 : index
    %c0_72 = arith.constant 0 : index
    %168 = vector.load %arg14[%c0_70, %c0_71, %c0_72] : memref<1x8x128xf32, #tpu.memory_space<vmem>>, vector<1x8x128xf32>
    %169 = vector.shape_cast %168 : vector<1x8x128xf32> to vector<8x128xf32>
    %170 = vector.shape_cast %167 : vector<8x128xf32> to vector<1x8x128xf32>
    tpu.vector_store %arg14[%c0_70, %c0_71, %c0_72], %170 {strides = array<i32>} : memref<1x8x128xf32, #tpu.memory_space<vmem>>, vector<1x8x128xf32>,
    return
  }
  func.func @transform_0(%arg0: i32) -> (i32, i32, i32) {
    %c0_i32 = arith.constant 0 : i32
    %c0_i32_0 = arith.constant 0 : i32
    %c0_i32_1 = arith.constant 0 : i32
    return %arg0, %c0_i32, %c0_i32_0 : i32, i32, i32
  }
  func.func @transform_1(%arg0: i32) -> (i32, i32) {
    %c0_i32 = arith.constant 0 : i32
    %c0_i32_0 = arith.constant 0 : i32
    %c0_i32_1 = arith.constant 0 : i32
    return %c0_i32, %c0_i32_0 : i32, i32
  }
  func.func @transform_2(%arg0: i32) -> (i32, i32) {
    %c0_i32 = arith.constant 0 : i32
    %c0_i32_0 = arith.constant 0 : i32
    %c0_i32_1 = arith.constant 0 : i32
    return %c0_i32, %c0_i32_0 : i32, i32
  }
  func.func @transform_3(%arg0: i32) -> (i32, i32) {
    %c0_i32 = arith.constant 0 : i32
    %c0_i32_0 = arith.constant 0 : i32
    %c0_i32_1 = arith.constant 0 : i32
    return %c0_i32, %c0_i32_0 : i32, i32
  }
  func.func @transform_4(%arg0: i32) -> (i32, i32) {
    %c0_i32 = arith.constant 0 : i32
    %c0_i32_0 = arith.constant 0 : i32
    %c0_i32_1 = arith.constant 0 : i32
    return %c0_i32, %c0_i32_0 : i32, i32
  }
  func.func @transform_5(%arg0: i32) -> (i32, i32) {
    %c0_i32 = arith.constant 0 : i32
    %c0_i32_0 = arith.constant 0 : i32
    %c0_i32_1 = arith.constant 0 : i32
    return %c0_i32, %c0_i32_0 : i32, i32
  }
  func.func @transform_6(%arg0: i32) -> (i32, i32) {
    %c0_i32 = arith.constant 0 : i32
    %c0_i32_0 = arith.constant 0 : i32
    %c0_i32_1 = arith.constant 0 : i32
    return %c0_i32, %c0_i32_0 : i32, i32
  }
  func.func @transform_7(%arg0: i32) -> (i32, i32) {
    %c0_i32 = arith.constant 0 : i32
    %c0_i32_0 = arith.constant 0 : i32
    %c0_i32_1 = arith.constant 0 : i32
    return %c0_i32, %c0_i32_0 : i32, i32
  }
  func.func @transform_8(%arg0: i32) -> (i32, i32) {
    %c0_i32 = arith.constant 0 : i32
    %c0_i32_0 = arith.constant 0 : i32
    %c0_i32_1 = arith.constant 0 : i32
    return %c0_i32, %c0_i32_0 : i32, i32
  }
  func.func @transform_9(%arg0: i32) -> (i32, i32) {
    %c0_i32 = arith.constant 0 : i32
    %c0_i32_0 = arith.constant 0 : i32
    %c0_i32_1 = arith.constant 0 : i32
    return %c0_i32, %c0_i32_0 : i32, i32
  }
  func.func @transform_10(%arg0: i32) -> (i32, i32) {
    %c0_i32 = arith.constant 0 : i32
    %c0_i32_0 = arith.constant 0 : i32
    %c0_i32_1 = arith.constant 0 : i32
    return %c0_i32, %c0_i32_0 : i32, i32
  }
  func.func @transform_11(%arg0: i32) -> (i32, i32) {
    %c0_i32 = arith.constant 0 : i32
    %c0_i32_0 = arith.constant 0 : i32
    %c0_i32_1 = arith.constant 0 : i32
    return %c0_i32, %c0_i32_0 : i32, i32
  }
  func.func @transform_12(%arg0: i32) -> (i32, i32) {
    %c0_i32 = arith.constant 0 : i32
    %c0_i32_0 = arith.constant 0 : i32
    %c0_i32_1 = arith.constant 0 : i32
    return %c0_i32, %c0_i32_0 : i32, i32
  }
  func.func @transform_13(%arg0: i32) -> (i32, i32, i32) {
    %c0_i32 = arith.constant 0 : i32
    %c0_i32_0 = arith.constant 0 : i32
    %c0_i32_1 = arith.constant 0 : i32
    return %arg0, %c0_i32, %c0_i32_0 : i32, i32, i32
  }
}

</mosaic_0001>

<bundles_post_ra>
// kernel: tpu_custom_call.1
= control target key start
LH: loop header
LB: loop body
LE: loop exit
PB: predicated region body
PF: predicated region fallthrough
CT: control target
= control target key end

     0   :  { %s2837_s0 = inlined_call_operand.hbm [shape: f32[2,8,128], index: 0, kind: input, shape index: {}]   ;;  %s2838_s1 = inlined_call_operand.hbm [shape: f32[1,128], index: 1, kind: input, shape index: {}]   ;;  %s2839_s2 = inlined_call_operand.hbm [shape: f32[1,128], index: 2, kind: input, shape index: {}]   ;;  %s2840_s3 = inlined_call_operand.hbm [shape: bf16[128,384], index: 3, kind: input, shape index: {}]   ;;  %s2841_s4 = inlined_call_operand.vmem [shape: f32[1,384], index: 4, kind: input, shape index: {}]   ;;  %s2842_s5 = inlined_call_operand.hbm [shape: bf16[128,128], index: 5, kind: input, shape index: {}]   ;;  %s2843_s6 = inlined_call_operand.hbm [shape: f32[1,128], index: 6, kind: input, shape index: {}]   ;;  %s2844_s7 = inlined_call_operand.vmem [shape: f32[1,128], index: 7, kind: input, shape index: {}]   ;;  %s2845_s8 = inlined_call_operand.vmem [shape: f32[1,128], index: 8, kind: input, shape index: {}]   ;;  %s2846_s9 = inlined_call_operand.hbm [shape: bf16[128,256], index: 9, kind: input, shape index: {}]   ;;  %s2847_s10 = inlined_call_operand.vmem [shape: f32[1,256], index: 10, kind: input, shape index: {}]   ;;  %s2848_s11 = inlined_call_operand.hbm [shape: bf16[256,128], index: 11, kind: input, shape index: {}]   ;;  %s2849_s12 = inlined_call_operand.vmem [shape: f32[1,128], index: 12, kind: input, shape index: {}]   ;;  %s2850_s13 = inlined_call_operand.hbm [shape: f32[2,8,128], index: 13, kind: output, shape index: {}]  }
   0x1   :  { %2852 = sst [smem:[#allocation24_spill]] %s2838_s1 }
   0x2   :  { %2853 = sst [smem:[#allocation25_spill]] %s2839_s2 }
   0x3   :  { %2854 = sst [smem:[#allocation26_spill]] %s2840_s3 }
   0x4   :  { %2855 = sst [smem:[#allocation27_spill]] %s2842_s5 }
   0x5   :  { %2856 = sst [smem:[#allocation28_spill]] %s2847_s10 }
   0x6   :  { %2857 = sst [smem:[#allocation29_spill]] %s2849_s12 }
   0x7   :  { %2858 = sst [smem:[#allocation30_spill]] %s2850_s13 }
   0x8   :  { %18 = vsyncpa [#allocation4], 0 }
   0x9   :  { %20 = vsyncpa [#allocation4 + $0x1], 0 }
   0xa   :  { %21 = vsyncpa [#allocation7], 0 }
   0xb   :  { %22 = vsyncpa [#allocation10], 0 }
   0xc   :  { %23 = vsyncpa [#allocation13], 0 }
   0xd   :  { %24 = vsyncpa [#allocation16], 0 }
   0xe   :  { %25 = vsyncpa [#allocation5], 0 }
   0xf   :  { %27 = vsyncpa [#allocation5 + $0x1], 0  ;;  %s2571_s25 = smov 0   ;;  %s2573_s26 = smov 0  }
  0x10   :  { %s2575_s27 = smov 0   ;;  %s2577_s28 = smov 0  }
  0x11 LB: > { %s2859_s1 = sld [smem:[#allocation24_spill]]  ;;  %s2595_s15 = sadd.s32 4294967295, %s2482_s28   ;;  %s2482_s28 = sphi %s2577_s28, %s2876_s28   ;;  %s2478_s27 = sphi %s2575_s27, %s2875_s27   ;;  %s2474_s26 = sphi %s2573_s26, %s2874_s26   ;;  %s2470_s25 = sphi %s2571_s25, %s2873_s25  }
  0x12   : > { %p1648_p0 = scmp.ge.s32.totalorder %s2482_s28, 1  ;;  %p54_p1 = scmp.eq.s32.totalorder %s2595_s15, 0 }
  0x13   : > { %p342_p2 = scmp.lt.s32.totalorder %s2482_s28, 3  ;;  %s2484_s17 = smov [#allocation6]  }
  0x14   : > { %s356_s18 = sshll.u32 %s2484_s17, 4  ;;  %s2861_s3 = sld [smem:[#allocation26_spill]]  ;;  %s357_s18 = int_to_ptr.vmem [resolvable:$true] %s356_s18 }
  0x15   : > { %p2600_p3 = pnand %p1648_p0, %p342_p2  ;;  %s2485_s23 = smov [#allocation9]  }
  0x16   : > { %s379_s24 = sshll.u32 %s2485_s23, 4  ;;  %s2486_s29 = smov 192   ;;  %s380_s24 = int_to_ptr.vmem [resolvable:$true] %s379_s24 }
  0x17   : > { %s354_s14 = sshll.u32 %s2859_s1, 4  ;;  %p2033_p5 = pneg %p2600_p3  ;;  %s355_s14 = int_to_ptr.hbm [resolvable:$true] %s354_s14 }
  0x18   : > { %s2487_s30 = smov 12   ;;  %s409_s20 = sshll.u32 %s2843_s6, 4  ;;  %s410_s20 = int_to_ptr.hbm [resolvable:$true] %s409_s20 }
  0x19   : > { %p2612_p6 = pnand %p2033_p5, %p54_p1  ;;  %s2488_s1 = smov [#allocation12]  }
  0x1a   : > { %s377_s21 = sshll.u32 %s2861_s3, 4  ;;  %s411_s3 = sshll.u32 %s2488_s1, 4  ;;  %s378_s21 = int_to_ptr.hbm [resolvable:$true] %s377_s21  ;;  %s412_s3 = int_to_ptr.vmem [resolvable:$true] %s411_s3 }
  0x1b   : > { %2036 = dma.hbm_to_vmem [thread:$0]  (!%p2612_p6), %s355_s14, 16, %s357_s18, [#allocation7]  }
  0x1c   : > { %2042 = dma.hbm_to_vmem [thread:$0]  (!%p2612_p6), %s378_s21, 3072, %s380_s24, [#allocation10], %s2486_s29, %s2486_s29, %s2487_s30  }
  0x1d   : > { %s2863_s2 = sld [smem:[#allocation25_spill]]  ;;  %s2489_s14 = smov [#allocation8]  }
  0x1e   : > { %2048 = dma.hbm_to_vmem [thread:$0]  (!%p2612_p6), %s410_s20, 16, %s412_s3, [#allocation13]  }
  0x1f   : > { %s368_s18 = sshll.u32 %s2489_s14, 4  ;;  %s2864_s5 = sld [smem:[#allocation27_spill]]  ;;  %s369_s18 = int_to_ptr.vmem [resolvable:$true] %s368_s18 }
  0x20   : > { %s2490_s1 = smov [#allocation11]   ;;  %s426_s30 = sshll.u32 %s2846_s9, 4  ;;  %s427_s30 = int_to_ptr.hbm [resolvable:$true] %s426_s30 }
  0x21   : > { %s396_s29 = sshll.u32 %s2490_s1, 4  ;;  %s2491_s3 = smov 64   ;;  %s397_s29 = int_to_ptr.vmem [resolvable:$true] %s396_s29 }
  0x22   : > { %s2492_s17 = smov 4   ;;  %s2493_s10 = smov [#allocation14]  }
  0x23   : > { %s366_s23 = sshll.u32 %s2863_s2, 4  ;;  %s428_s19 = sshll.u32 %s2493_s10, 4  ;;  %s367_s23 = int_to_ptr.hbm [resolvable:$true] %s366_s23  ;;  %s429_s19 = int_to_ptr.vmem [resolvable:$true] %s428_s19 }
  0x24   : > { %2039 = dma.hbm_to_vmem [thread:$0]  (!%p2612_p6), %s367_s23, 16, %s369_s18, [#allocation7]  }
  0x25   : > { %s394_s24 = sshll.u32 %s2864_s5, 4  ;;  %s2494_s20 = smov 128   ;;  %s395_s24 = int_to_ptr.hbm [resolvable:$true] %s394_s24 }
  0x26   : > { %2045 = dma.hbm_to_vmem [thread:$0]  (!%p2612_p6), %s395_s24, 1024, %s397_s29, [#allocation10], %s2491_s3, %s2491_s3, %s2492_s17  }
  0x27   : > { %s2495_s23 = smov 8   ;;  %s443_s21 = sshll.u32 %s2848_s11, 4  ;;  %s444_s21 = int_to_ptr.hbm [resolvable:$true] %s443_s21 }
  0x28   : > { %2051 = dma.hbm_to_vmem [thread:$0]  (!%p2612_p6), %s427_s30, 2048, %s429_s19, [#allocation13], %s2494_s20, %s2494_s20, %s2495_s23  }
  0x29   : > { %s2496_s24 = smov [#allocation15]   ;;  %s1647_s29 = sadd.s32 4294967294, %s2482_s28  }
  0x2a   : > { %s445_s1 = sshll.u32 %s2496_s24, 4  ;;  %s2647_s12 = sadd.s32 1, %s2482_s28   ;;  %s446_s1 = int_to_ptr.vmem [resolvable:$true] %s445_s1 }
  0x2b   : > { %2054 = dma.hbm_to_vmem [thread:$0]  (!%p2612_p6), %s444_s21, 2048, %s446_s1, [#allocation16], %s2491_s3, %s2491_s3, %s2492_s17  }
  0x2c   : > { %s40_s13 = sadd.s32 1, %s2478_s27  ;;  %s37_s30 = ssub.s32 %s2482_s28, %s2647_s12 }
  0x2d   : > { %p47_p7 = scmp.ne.s32.totalorder %s2478_s27, %s2474_s26  ;;  %p38_p8 = scmp.eq.s32.totalorder %s37_s30, 0 }
  0x2e   : > { %p48_p9 = scmp.eq.s32.totalorder %s2482_s28, 0  ;;  %p53_p10 = scmp.ne.s32.totalorder %s2474_s26, %s2470_s25 }
  0x2f   : > { %p329_p11 = scmp.eq.s32.totalorder %s2595_s15, 1  ;;  %p335_p0 = scmp.eq.s32.totalorder %s1647_s29, 1 }
  0x30   : > { %s2659_s10 = scalar_select %p38_p8, %s2478_s27, %s40_s13  }
  0x31   : > { %p2663_p12 = por %p54_p1, %p53_p10  ;;  %p2667_p13 = por %p329_p11, %p47_p7 }
  0x32   : > { %p49_p2 = por %p48_p9, %p47_p7  ;;  %s462_s17 = sand.u32 1, %s2478_s27  }
  0x33   : > { %p2672_p5 = por %p335_p0, %p53_p10  ;;  %p2070_p6 = scmp.lt.s32.totalorder %s2482_s28, 2 }
  0x34   : > { %s1657_s20 = sshll.u32 %s462_s17, 3  ;;  %s1658_s23 = sshll.u32 %s2482_s28, 3 }
  0x35   : > { %s470_s21 = scalar_lea.hbm %s2837_s0, %s1658_s23  ;;  %s466_s1 = scalar_lea.vmem [#allocation3], %s1657_s20 }
  0x36   : > { %s472_s24 = sshll.u32 %s470_s21, 4  ;;  %s474_s13 = sshll.u32 %s466_s1, 4  ;;  %s473_s24 = int_to_ptr.hbm [resolvable:$true] %s472_s24  ;;  %s475_s13 = int_to_ptr.vmem [resolvable:$true] %s474_s13 }
  0x37   : > { %p2681_p8 = pnand %p2070_p6, %p49_p2  ;;  %s463_s30 = scalar_lea.sflag [#allocation4], %s462_s17 }
  0x38   : > { %s2370_s2 = sshra.s32 %s473_s24, 4  ;;  %s2377_s20 = scalar_lea.hbm %s2837_s0, 16  ;;  %s2371_s2 = int_to_ptr.hbm [resolvable:$true] %s2370_s2 }
  0x39   : > { %s2372_s5 = scalar_lea.hbm %s2371_s2, 8  ;;  %p2374_p9 = pneg %p2681_p8 }
  0x3a   : > { %p2373_p7 = scmp.ne.s32.totalorder %s2371_s2, %s2372_s5  ;;  %p2378_p0 = scmp.lt.s32.totalorder %s2371_s2, %s2837_s0 }
  0x3b   : > { %p2379_p2 = scmp.lt.s32.totalorder %s2377_s20, %s2372_s5 }
  0x3c   : > { %p2375_p10 = pnand %p2374_p9, %p2373_p7 }
  0x3d   : > { %p2380_p6 = por %p2379_p2, %p2378_p0 }
  0x3e   : > { %p2376_p11 = pneg %p2375_p10 }
  0x40   : > { %p2381_p4 = pnand %p2380_p6, %p2376_p11 }
  0x42   : > { %2384 = shalt.err (!%p2381_p4)
}
  0x43   : > { %2058 = dma.hbm_to_vmem [thread:$0]  (!%p2681_p8), %s473_s24, 128, %s475_s13, %s463_s30  }
  0x44   : > { %483 = sbr.rel (%p2600_p3) target bundleno = 2236 (0x8bc), region = 72  ;;  %s2698_s17 = sand.u32 (!%p2600_p3), 1, %s2474_s26  }
  0x45   : > { %s1660_s1 = sshll.u32 (!%p2600_p3), %s2698_s17, 3  ;;  %s486_s23 = scalar_lea.sflag (!%p2600_p3), [#allocation4], %s2698_s17 }
  0x46   : > { %s489_s2 = scalar_lea.vmem (!%p2600_p3), [#allocation3], %s1660_s1 }
  0x49   : > { %2445 = dma.done.wait (%p2663_p12), %s486_s23, 128  }
  0x4a   : > { %2447 = vsyncadd (%p2663_p12), %s486_s23, 4294967168 }
  0x4b   : > { %2449 = dma.done.wait (%p54_p1), [#allocation7], 32  }
  0x4c   : > { %2451 = vsyncadd (%p54_p1), [#allocation7], 4294967264 }
  0x4d   : > { %2453 = dma.done.wait (%p54_p1), [#allocation10], 4096  }
  0x4e   : > { %2455 = vsyncadd (%p54_p1), [#allocation10], 4294963200 }
  0x4f   : > { %2457 = dma.done.wait (%p54_p1), [#allocation13], 2064  }
  0x50   : > { %2459 = vsyncadd (%p54_p1), [#allocation13], 4294965232 }
  0x51   : > { %2461 = dma.done.wait (%p54_p1), [#allocation16], 2048  }
  0x52   : > { %2463 = vsyncadd (%p54_p1), [#allocation16], 4294965248  ;;  %v2724_v0 = vld [vmem:[%s489_s2] sm:$0xff]  ;;  %v2497_v1 = vmov 128.0   ;;  %v1755_v2 = vld [vmem:[#allocation9 + $0xa8] sm:$0xf] }
  0x53   : > { %572 = vadd.xlane.f32.xlu0 %v2724_v0  ;;  %2134 = vrcp.f32 %v2497_v1  ;;  %v1959_v3 = vld [vmem:[#allocation9 + $0xb0] sm:$0xf0]  ;;  %v1958_v4 = vld [vmem:[#allocation9 + $0xac] sm:$0xf]  ;;  %v1757_v6 = vld [vmem:[#allocation9 + $0xb4] sm:$0xf0] }
  0x54   : > { %v1756_v5 = vor.u32 %v1959_v3, %v1755_v2  ;;  %v1763_v7 = vld [vmem:[#allocation9 + $0xb0] sm:$0xf]  ;;  %v1960_v8 = vld [vmem:[#allocation9 + $0xb8] sm:$0xf0]  ;;  %v1760_v9 = vor.u32 %v1958_v4, %v1757_v6  ;;  %v1955_v23 = vld [vmem:[#allocation9 + $0x94] sm:$0xf] }
  0x55   : > { %v1764_v10 = vor.u32 %v1960_v8, %v1763_v7  ;;  %v1743_v21 = vld [vmem:[#allocation9 + $0x90] sm:$0xf]  ;;  %v1956_v22 = vld [vmem:[#allocation9 + $0x98] sm:$0xf0]  ;;  %v1745_v25 = vld [vmem:[#allocation9 + $0x9c] sm:$0xf0] }
  0x56   : > { %776 = vmatpush.bf16.msra.mxu0 %v1756_v5  ;;  %789 = vmatpush.bf16.msra.mxu1 %v1760_v9  ;;  %v1744_v24 = vor.u32 %v1956_v22, %v1743_v21  ;;  %v1751_v26 = vld [vmem:[#allocation9 + $0x98] sm:$0xf]  ;;  %v1957_v27 = vld [vmem:[#allocation9 + $0xa0] sm:$0xf0]  ;;  %v1748_v28 = vor.u32 %v1955_v23, %v1745_v25  ;;  %v1952_v32 = vld [vmem:[#allocation9 + $0x7c] sm:$0xf] }
  0x57   : > { %802 = vmatpush.bf16.msra.mxu2 %v1764_v10  ;;  %v1752_v29 = vor.u32 %v1957_v27, %v1751_v26  ;;  %v1731_v30 = vld [vmem:[#allocation9 + $0x78] sm:$0xf]  ;;  %v1953_v31 = vld [vmem:[#allocation9 + $0x80] sm:$0xf0]  ;;  %v1733_v34 = vld [vmem:[#allocation9 + $0x84] sm:$0xf0] }
  0x58   : > { %v1732_v33 = vor.u32 %v1953_v31, %v1731_v30  ;;  %v1739_v35 = vld [vmem:[#allocation9 + $0x80] sm:$0xf]  ;;  %v1954_v36 = vld [vmem:[#allocation9 + $0x88] sm:$0xf0]  ;;  %v1736_v37 = vor.u32 %v1952_v32, %v1733_v34  ;;  %v1949_v41 = vld [vmem:[#allocation9 + $0x64] sm:$0xf] }
  0x59   : > { %v2135_v11 = vpop.eup %2134  ;;  %v1740_v38 = vor.u32 %v1954_v36, %v1739_v35  ;;  %v1719_v39 = vld [vmem:[#allocation9 + $0x60] sm:$0xf]  ;;  %v1950_v40 = vld [vmem:[#allocation9 + $0x68] sm:$0xf0]  ;;  %v1721_v43 = vld [vmem:[#allocation9 + $0x6c] sm:$0xf0] }
  0x5a   : > { %v575_v12 = vmul.f32 128.0, %v2135_v11  ;;  %vm579_vm0 = vweird.f32 %v2135_v11  ;;  %777 = vmatpush.bf16.msra.mxu0 %v1744_v24  ;;  %790 = vmatpush.bf16.msra.mxu1 %v1748_v28  ;;  %v1720_v42 = vor.u32 %v1950_v40, %v1719_v39  ;;  %v1727_v44 = vld [vmem:[#allocation9 + $0x68] sm:$0xf]  ;;  %v1951_v45 = vld [vmem:[#allocation9 + $0x70] sm:$0xf0]  ;;  %v1724_v46 = vor.u32 %v1949_v41, %v1721_v43  ;;  %s2498_s22 = smov 64  }
  0x5b   : > { %803 = vmatpush.bf16.msra.mxu2 %v1752_v29  ;;  %v1728_v47 = vor.u32 %v1951_v45, %v1727_v44  ;;  %v1707_v48 = vld [vmem:[#allocation9 + $0x48] sm:$0xf]  ;;  %v1947_v49 = vld [vmem:[#allocation9 + $0x50] sm:$0xf0]  ;;  %v1946_v50 = vld [vmem:[#allocation9 + $0x4c] sm:$0xf] }
  0x5c   : > { %v576_v13 = vsub.f32 1.0, %v575_v12  ;;  %v1708_v51 = vor.u32 %v1947_v49, %v1707_v48  ;;  %v1709_v52 = vld [vmem:[#allocation9 + $0x54] sm:$0xf0]  ;;  %v1715_v53 = vld [vmem:[#allocation9 + $0x50] sm:$0xf]  ;;  %vm818_vm4 = vcmask 261120  }
  0x5d   : > { %v1948_v54 = vld [vmem:[#allocation9 + $0x58] sm:$0xf0]  ;;  %v1712_v55 = vor.u32 %v1946_v50, %v1709_v52  ;;  %v1695_v57 = vld [vmem:[#allocation9 + $0x30] sm:$0xf]  ;;  %v1943_v59 = vld [vmem:[#allocation9 + $0x34] sm:$0xf] }
  0x5e   : > { %v577_v14 = vmul.f32 %v2135_v11, %v576_v13  ;;  %778 = vmatpush.bf16.msra.mxu0 %v1732_v33  ;;  %791 = vmatpush.bf16.msra.mxu1 %v1736_v37  ;;  %v1716_v56 = vor.u32 %v1948_v54, %v1715_v53  ;;  %v1944_v58 = vld [vmem:[#allocation9 + $0x38] sm:$0xf0]  ;;  %v1697_v61 = vld [vmem:[#allocation9 + $0x3c] sm:$0xf0]  ;;  %v1703_v62 = vld [vmem:[#allocation9 + $0x38] sm:$0xf] }
  0x5f   : > { %804 = vmatpush.bf16.msra.mxu2 %v1740_v38  ;;  %v1696_v60 = vor.u32 %v1944_v58, %v1695_v57  ;;  %v1945_v63 = vld [vmem:[#allocation9 + $0x40] sm:$0xf0]  ;;  %v1700_v1 = vor.u32 %v1943_v59, %v1697_v61  ;;  %v1683_v3 = vld [vmem:[#allocation9 + $0x18] sm:$0xf]  ;;  %v1940_v5 = vld [vmem:[#allocation9 + $0x1c] sm:$0xf] }
  0x60   : > { %v578_v15 = vadd.f32 %v2135_v11, %v577_v14  ;;  %v1704_v2 = vor.u32 %v1945_v63, %v1703_v62  ;;  %v1941_v4 = vld [vmem:[#allocation9 + $0x20] sm:$0xf0]  ;;  %v1685_v7 = vld [vmem:[#allocation9 + $0x24] sm:$0xf0]  ;;  %v1691_v8 = vld [vmem:[#allocation9 + $0x20] sm:$0xf] }
  0x61   : > { %v1684_v6 = vor.u32 %v1941_v4, %v1683_v3  ;;  %v1942_v9 = vld [vmem:[#allocation9 + $0x28] sm:$0xf0]  ;;  %v1688_v10 = vor.u32 %v1940_v5, %v1685_v7  ;;  %v1671_v12 = vld [vmem:[#allocation9] sm:$0xf]  ;;  %v1937_v14 = vld [vmem:[#allocation9 + $0x4] sm:$0xf] }
  0x62   : > { %v2727_v16 = vsel %vm579_vm0, %v2135_v11, %v578_v15  ;;  %779 = vmatpush.bf16.msra.mxu0 %v1720_v42  ;;  %792 = vmatpush.bf16.msra.mxu1 %v1724_v46  ;;  %v1692_v11 = vor.u32 %v1942_v9, %v1691_v8  ;;  %v1938_v13 = vld [vmem:[#allocation9 + $0x8] sm:$0xf0]  ;;  %v2128_v32 = vld [vmem:[#allocation6] ss:$0 sm:$0xff]  ;;  %v2129_v35 = vld [vmem:[#allocation8] ss:$0 sm:$0xff] }
  0x63   : > { %805 = vmatpush.bf16.msra.mxu2 %v1728_v47  ;;  %v1672_v15 = vor.u32 %v1938_v13, %v1671_v12  ;;  %v640_v39 = vld [vmem:[%s2841_s4] sm:$0x7]  ;;  %s2499_s24 = smov 96   ;;  %vm855_vm5 = vcmask 1043456   ;;  %s2500_s13 = smov 32   ;;  %vm839_vm6 = vcmask 64512  }
  0x64   : > { %v643_v40 = vperm.slane %v640_v39, 1  ;;  %v642_v41 = vperm.slane %v640_v39, 0  ;;  %vm943_vm7 = vcmask 523520   ;;  %vm1006_vm8 = vcmask 785920   ;;  %s2869_s23 = sld [smem:[#allocation28_spill]]  ;;  %s1934_s2 = sshll.u32 %s2595_s15, 3 }
  0x65   : > { %vm1069_vm9 = vcmask 1048320   ;;  %s2871_s29 = sld [smem:[#allocation30_spill]]  ;;  %s567_s14 = scalar_lea.vmem [#allocation17], %s1660_s1 }
  0x66   : > { %780 = vmatpush.bf16.msra.mxu0 %v1708_v51  ;;  %793 = vmatpush.bf16.msra.mxu1 %v1712_v55  ;;  %s1507_s20 = sshll.u32 %s567_s14, 4  ;;  %s1495_s15 = scalar_lea.sflag [#allocation5], %s2698_s17  ;;  %s1508_s20 = int_to_ptr.vmem [resolvable:$true] %s1507_s20 }
  0x67   : > { %806 = vmatpush.bf16.msra.mxu2 %v1716_v56 }
  0x6a   : > { %781 = vmatpush.bf16.msra.mxu0 %v1696_v60  ;;  %794 = vmatpush.bf16.msra.mxu1 %v1700_v1 }
  0x6b   : > { %807 = vmatpush.bf16.msra.mxu2 %v1704_v2  ;;  %s1505_s30 = scalar_lea.hbm %s2871_s29, %s1934_s2  ;;  %s2420_s1 = scalar_lea.hbm %s2871_s29, 16 }
  0x6c   : > { %s1509_s18 = sshll.u32 %s1505_s30, 4  ;;  %s1510_s18 = int_to_ptr.hbm [resolvable:$true] %s1509_s18 }
  0x6d   : > { %s2414_s21 = sshra.s32 %s1510_s18, 4  ;;  %s2415_s21 = int_to_ptr.hbm [resolvable:$true] %s2414_s21 }
  0x6e   : > { %782 = vmatpush.bf16.msra.mxu0 %v1684_v6  ;;  %795 = vmatpush.bf16.msra.mxu1 %v1688_v10  ;;  %p2421_p12 = scmp.lt.s32.totalorder %s2415_s21, %s2871_s29 }
  0x6f   : > { %808 = vmatpush.bf16.msra.mxu2 %v1692_v11 }
  0x72   : > { %783 = vmatpush.bf16.msra.mxu0 %v1672_v15 }
  0xc6   : > { %v573_v17 = vpop.xlane.xlu0 %572 }
  0xc7   : > { %v581_v18 = vmul.f32 %v2727_v16, %v573_v17  ;;  %v1673_v17 = vld [vmem:[#allocation9 + $0xc] sm:$0xf0] }
  0xc8   : > { %v1676_v21 = vor.u32 %v1937_v14, %v1673_v17 }
  0xc9   : > { %v2731_v19 = vsub.f32 %v2724_v0, %v581_v18  ;;  %v1679_v18 = vld [vmem:[#allocation9 + $0x8] sm:$0xf] }
  0xca   : > { %796 = vmatpush.bf16.msra.mxu1 %v1676_v21 }
  0xcb   : > { %v583_v20 = vmul.f32 %v2731_v19, %v2731_v19 }
  0xcd   : > { %584 = vadd.xlane.f32.xlu0 %v583_v20  ;;  %v1939_v20 = vld [vmem:[#allocation9 + $0x10] sm:$0xf0] }
  0xce   : > { %v1680_v22 = vor.u32 %v1939_v20, %v1679_v18 }
  0xd0   : > { %809 = vmatpush.bf16.msra.mxu2 %v1680_v22 }
 0x140   : > { %v585_v23 = vpop.xlane.xlu0 %584 }
 0x141   : > { %v586_v24 = vmul.f32 %v585_v23, %v2727_v16 }
 0x143   : > { %v587_v25 = vadd.f32 1e-05, %v586_v24 }
 0x145   : > { %2136 = vrsqrt.f32 %v587_v25  ;;  %vm594_vm2 = vweird.f32 %v587_v25 }
 0x14b   : > { %v2137_v26 = vpop.eup %2136 }
 0x14c   : > { %v589_v27 = vmul.f32 %v2137_v26, %v587_v25  ;;  %vm595_vm1 = vweird.f32 %v2137_v26 }
 0x14d   : > { %vm596_vm3 = vmor %vm594_vm2, %vm595_vm1 }
 0x14e   : > { %v590_v28 = vmul.f32 %v2137_v26, %v589_v27 }
 0x150   : > { %v591_v29 = vmul.f32 0.5, %v590_v28 }
 0x152   : > { %v592_v30 = vsub.f32 1.5, %v591_v29 }
 0x154   : > { %v593_v31 = vmul.f32 %v2137_v26, %v592_v30 }
 0x156   : > { %v597_v33 = vsel %vm596_vm3, %v2137_v26, %v593_v31 }
 0x157   : > { %v598_v34 = vmul.f32 %v597_v33, %v2731_v19  ;;  %v644_v19 = vperm.slane %v640_v39, 2 }
 0x159   : > { %v602_v36 = vmul.f32 %v2128_v32, %v598_v34 }
 0x15b   : > { %v606_v37 = vadd.f32 %v2129_v35, %v602_v36 }
 0x15d   : > { %v607_v38 = vpack.c.bf16 %v606_v37, %v606_v37 }
 0x15f   : > { %784 = vmatmul.bf16.vlgmr.msra.gmra.mxu0 %v607_v38  ;;  %797 = vmatmul.bf16.vlgmr.msra.gmra.mxu1 %v607_v38 }
 0x160   : > { %810 = vmatmul.bf16.vlgmr.msra.gmra.mxu2 %v607_v38 }
 0x1dc   : > { %v785_v42 = vpop.f32.mrf.mxu0  ;;  %v798_v43 = vpop.f32.mrf.mxu1 }
 0x1dd   : > { %v799_v44 = vadd.f32 %v798_v43, %v643_v40  ;;  %v786_v45 = vadd.f32 %v785_v42, %v642_v41 }
 0x1df   : > { %v816_v46 = vpack.c.bf16 %v799_v44, %v799_v44  ;;  %v815_v49 = vpack.c.bf16 %v786_v45, %v786_v45 }
 0x1e1   : > { %v879_v47 = vunpack.c.l.b16 %v816_v46  ;;  %v823_v48 = vsel %vm818_vm4, %v816_v46, 0  ;;  %v874_v56 = vunpack.c.l.b16 %v815_v49 }
 0x1e2   : > { %832 = vmatpush.bf16.xpose.msra.mxu3 %v823_v48 }
 0x1e3   : > { %v880_v50 = vpack.c.b16 %v879_v47, %v879_v47  ;;  %v811_v51 = vpop.f32.mrf.mxu2  ;;  %v875_v58 = vpack.c.b16 %v874_v56, %v874_v56 }
 0x1e4   : > { %v812_v52 = vadd.f32 %v811_v51, %v644_v19  ;;  %v787_v53 = vpop.f32.mrf.mxu0  ;;  %v800_v54 = vpop.f32.mrf.mxu1 }
 0x1e5   : > { %947 = vrot.lane.b32.xlu0 %v880_v50, %s2498_s22  ;;  %881 = vrot.lane.b32.xlu2 %v880_v50, %s2499_s24 }
 0x1e6   : > { %v817_v55 = vpack.c.bf16 %v812_v52, %v812_v52 }
 0x1e8   : > { %v857_v57 = vsel %vm855_vm5, %v817_v55, 0  ;;  %v916_v17 = vunpack.c.l.b16 %v817_v55 }
 0x1e9   : > { %1765 = vmatmul.msk.bf16.vlgmr.msra.gmra.mxu3 %vm818_vm4, %v815_v49 }
 0x1ea   : > { %866 = vmatpush.bf16.msrb.mxu3 %v857_v57  ;;  %v917_v18 = vpack.c.b16 %v916_v17, %v916_v17  ;;  %v1964_v17 = vld [vmem:[#allocation11 + $0x18] sm:$0xff] }
 0x1eb   : > { %v813_v59 = vpop.f32.mrf.mxu2 }
 0x1ed   : > { %876 = vrot.lane.b32.xlu2 %v875_v58, %s2499_s24 }
 0x1f5   : > { %945 = vrot.lane.b32.xlu2 %v875_v58, %s2498_s22 }
 0x1fd   : > { %1008 = vrot.lane.b32.xlu2 %v875_v58, %s2500_s13 }
 0x23f   : > { %v882_v60 = vpop.permute.xlu2 %881 }
 0x240   : > { %v887_v61 = vsel %vm818_vm4, %v882_v60, 0 }
 0x241   : > { %896 = vmatpush.bf16.xpose.msra.mxu3 %v887_v61 }
 0x247   : > { %v877_v62 = vpop.permute.xlu2 %876 }
 0x24f   : > { %v946_v2 = vpop.permute.xlu2 %945 }
 0x257   : > { %v948_v63 = vpop.permute.xlu0 %947  ;;  %v1009_v29 = vpop.permute.xlu2 %1008 }
 0x258   : > { %v953_v1 = vsel %vm818_vm4, %v948_v63, 0 }
 0x259   : > { %962 = vmatpush.bf16.xpose.msrb.mxu2 %v953_v1 }
 0x260   : > { %1769 = vmatmul.msk.bf16.vlgmr.msrb.gmra.mxu2 %vm818_vm4, %v946_v2 }
 0x26c   : > { %v834_v3 = vpop.f32.mrf.mxu3 }
 0x26d   : > { %v838_v4 = vmul.f32 0.17677669, %v834_v3 }
 0x26f   : > { %v840_v5 = vsel %vm839_vm6, %v838_v4, -inf }
 0x270   : > { %841 = vmax.xlane.f32.xlu1 %v840_v5 }
 0x274   : > { %v836_v6 = vpop.f32.mrf.mxu3 }
 0x2e3   : > { %v964_v7 = vpop.f32.mrf.mxu2  ;;  %v842_v9 = vpop.xlane.xlu1 %841 }
 0x2e4   : > { %v968_v8 = vmul.f32 0.17677669, %v964_v7  ;;  %v843_v10 = vsub.f32 %v838_v4, %v842_v9  ;;  %v1968_v9 = vld [vmem:[#allocation11 + $0x38] sm:$0xff] }
 0x2e5   : > { %1141 = vmatpush.bf16.msrb.mxu1 %v1968_v9  ;;  %v1971_v9 = vld [vmem:[#allocation14 + $0x14] sm:$0xf] }
 0x2e6   : > { %v969_v11 = vsel %vm839_vm6, %v968_v8, -inf  ;;  %v844_v12 = vmul.f32 1.442695, %v843_v10  ;;  %v1967_v10 = vld [vmem:[#allocation11 + $0x30] sm:$0xff] }
 0x2e7   : > { %970 = vmax.xlane.f32.xlu0 %v969_v11 }
 0x2e8   : > { %2138 = vpow2.f32 %v844_v12  ;;  %v1966_v12 = vld [vmem:[#allocation11 + $0x28] sm:$0xff] }
 0x2e9   : > { %1142 = vmatpush.bf16.msrb.mxu1 %v1967_v10 }
 0x2eb   : > { %v966_v13 = vpop.f32.mrf.mxu2 }
 0x2ed   : > { %1143 = vmatpush.bf16.msrb.mxu1 %v1966_v12 }
 0x2ee   : > { %v2139_v14 = vpop.eup %2138 }
 0x2ef   : > { %v846_v15 = vsel %vm839_vm6, %v2139_v14, 0.0 }
 0x2f0   : > { %847 = vadd.xlane.f32.xlu1 %v846_v15  ;;  %v1965_v15 = vld [vmem:[#allocation11 + $0x20] sm:$0xff] }
 0x2f1   : > { %1144 = vmatpush.bf16.msrb.mxu1 %v1965_v15  ;;  %v1969_v15 = vld [vmem:[#allocation14 + $0x4] sm:$0xf] }
 0x2f5   : > { %1145 = vmatpush.bf16.msrb.mxu1 %v1964_v17 }
 0x2fb   : > { %918 = vrot.lane.b32.xlu0 %v917_v18, %s2499_s24 }
 0x309   : > { %1010 = vrot.lane.b32.xlu1 %v880_v50, %s2500_s13 }
 0x35a   : > { %v971_v21 = vpop.xlane.xlu0 %970 }
 0x35b   : > { %v972_v32 = vsub.f32 %v968_v8, %v971_v21  ;;  %v1961_v21 = vld [vmem:[#allocation11] sm:$0xff] }
 0x35d   : > { %v973_v33 = vmul.f32 1.442695, %v972_v32  ;;  %v1863_v32 = vld [vmem:[#allocation14 + $0x70] sm:$0xf] }
 0x363   : > { %v848_v20 = vpop.xlane.xlu1 %847 }
 0x364   : > { %2140 = vrcp.f32 %v848_v20  ;;  %v1962_v20 = vld [vmem:[#allocation11 + $0x8] sm:$0xff] }
 0x365   : > { %2142 = vpow2.f32 %v973_v33  ;;  %v1984_v33 = vld [vmem:[#allocation14 + $0x74] sm:$0xf0] }
 0x36a   : > { %v2141_v22 = vpop.eup %2140 }
 0x36b   : > { %v850_v23 = vmul.f32 %v2141_v22, %v2139_v14  ;;  %v2143_v37 = vpop.eup %2142 }
 0x36c   : > { %v975_v39 = vsel %vm839_vm6, %v2143_v37, 0.0 }
 0x36d   : > { %v919_v24 = vpop.permute.xlu0 %918  ;;  %v851_v25 = vpack.c.bf16 %v850_v23, %v850_v23 }
 0x36e   : > { %v924_v26 = vsel %vm855_vm5, %v919_v24, 0 }
 0x36f   : > { %933 = vmatpush.bf16.msrb.mxu0 %v924_v26  ;;  %1766 = vmatmul.msk.bf16.vlgmr.msrb.gmra.mxu3 %vm839_vm6, %v851_v25 }
 0x37b   : > { %v1011_v27 = vpop.permute.xlu1 %1010 }
 0x37c   : > { %v1016_v28 = vsel %vm818_vm4, %v1011_v27, 0  ;;  %v2130_v27 = vld [vmem:[#allocation12] ss:$0 sm:$0xff] }
 0x37d   : > { %1025 = vmatpush.bf16.xpose.msrb.mxu3 %v1016_v28 }
 0x37f   : > { %1767 = vmatmul.msk.bf16.vlgmr.msra.gmra.mxu3 %vm818_vm4, %v877_v62 }
 0x38f   : > { %1771 = vmatmul.msk.bf16.vlgmr.msrb.gmra.mxu3 %vm818_vm4, %v1009_v29 }
 0x3f2   : > { %v868_v30 = vpop.f32.mrf.mxu3 }
 0x3f3   : > { %872 = vst.msk [vmem:[#allocation2] sm:$0xff] %vm818_vm4, %v868_v30 }
 0x3fa   : > { %v870_v31 = vpop.f32.mrf.mxu3 }
 0x402   : > { %v898_v34 = vpop.f32.mrf.mxu3 }
 0x403   : > { %v902_v35 = vmul.f32 0.17677669, %v898_v34  ;;  %v1983_v34 = vld [vmem:[#allocation14 + $0x74] sm:$0xf] }
 0x405   : > { %v903_v36 = vsel %vm839_vm6, %v902_v35, -inf }
 0x406   : > { %904 = vmax.xlane.f32.xlu2 %v903_v36  ;;  %v1865_v36 = vld [vmem:[#allocation14 + $0x78] sm:$0xf0] }
 0x40a   : > { %v900_v38 = vpop.f32.mrf.mxu3 }
 0x40e   : > { %976 = vadd.xlane.f32.xlu2 %v975_v39 }
 0x412   : > { %v1027_v40 = vpop.f32.mrf.mxu3 }
 0x413   : > { %v1031_v41 = vmul.f32 0.17677669, %v1027_v40 }
 0x415   : > { %v1032_v42 = vsel %vm839_vm6, %v1031_v41, -inf }
 0x416   : > { %1033 = vmax.xlane.f32.xlu1 %v1032_v42  ;;  %v1982_v42 = vld [vmem:[#allocation14 + $0x64] sm:$0xf0] }
 0x41a   : > { %v1029_v43 = vpop.f32.mrf.mxu3 }
 0x41b   : > { %v1981_v43 = vld [vmem:[#allocation14 + $0x64] sm:$0xf] }
 0x479   : > { %v905_v44 = vpop.xlane.xlu2 %904 }
 0x47a   : > { %v906_v45 = vsub.f32 %v902_v35, %v905_v44  ;;  %v1864_v35 = vor.u32 %v1984_v33, %v1863_v32 }
 0x47c   : > { %v907_v46 = vmul.f32 1.442695, %v906_v45  ;;  %v1857_v45 = vld [vmem:[#allocation14 + $0x68] sm:$0xf0] }
 0x47e   : > { %2144 = vpow2.f32 %v907_v46  ;;  %v1860_v46 = vor.u32 %v1981_v43, %v1857_v45  ;;  %v1989_v43 = vld [vmem:[#allocation15 + $0x20] sm:$0xff]  ;;  %v1988_v45 = vld [vmem:[#allocation15 + $0x18] sm:$0xff] }
 0x481   : > { %v977_v53 = vpop.xlane.xlu2 %976 }
 0x484   : > { %v2145_v19 = vpop.eup %2144 }
 0x485   : > { %v909_v47 = vsel %vm839_vm6, %v2145_v19, 0.0 }
 0x486   : > { %910 = vadd.xlane.f32.xlu2 %v909_v47  ;;  %v1980_v47 = vld [vmem:[#allocation14 + $0x54] sm:$0xf0] }
 0x489   : > { %v1034_v48 = vpop.xlane.xlu1 %1033 }
 0x48a   : > { %v1035_v49 = vsub.f32 %v1031_v41, %v1034_v48  ;;  %v1855_v41 = vld [vmem:[#allocation14 + $0x60] sm:$0xf]  ;;  %v1979_v48 = vld [vmem:[#allocation14 + $0x54] sm:$0xf] }
 0x48b   : > { %v1856_v44 = vor.u32 %v1982_v42, %v1855_v41  ;;  %v1990_v41 = vld [vmem:[#allocation15 + $0x28] sm:$0xff] }
 0x48c   : > { %v1036_v50 = vmul.f32 1.442695, %v1035_v49  ;;  %v1998_v42 = vld [vmem:[#allocation15 + $0x68] sm:$0xff] }
 0x48e   : > { %2146 = vpow2.f32 %v1036_v50  ;;  %v1849_v50 = vld [vmem:[#allocation14 + $0x58] sm:$0xf0] }
 0x48f   : > { %2148 = vrcp.f32 %v977_v53  ;;  %v1978_v53 = vld [vmem:[#allocation14 + $0x44] sm:$0xf0] }
 0x494   : > { %v2147_v51 = vpop.eup %2146 }
 0x495   : > { %v1038_v52 = vsel %vm839_vm6, %v2147_v51, 0.0  ;;  %v2149_v55 = vpop.eup %2148 }
 0x496   : > { %1039 = vadd.xlane.f32.xlu1 %v1038_v52  ;;  %v979_v57 = vmul.f32 %v2149_v55, %v2143_v37  ;;  %v1868_v37 = vor.u32 %v1983_v34, %v1865_v36  ;;  %v1839_v52 = vld [vmem:[#allocation14 + $0x40] sm:$0xf] }
 0x497   : > { %v1840_v55 = vor.u32 %v1978_v53, %v1839_v52 }
 0x498   : > { %v980_v62 = vpack.c.bf16 %v979_v57, %v979_v57  ;;  %1301 = vmatpush.bf16.msra.mxu3 %v1868_v37  ;;  %v2132_v37 = vld [vmem:[%s2845_s8] ss:$0 sm:$0xff] }
 0x49c   : > { %1302 = vmatpush.bf16.msra.mxu3 %v1860_v46  ;;  %v1996_v46 = vld [vmem:[#allocation15 + $0x58] sm:$0xff] }
 0x49e   : > { %981 = vrot.lane.b32.xlu2 %v917_v18, %s2498_s22 }
 0x4af   : > { %1044 = vrot.lane.b32.xlu1 %v917_v18, %s2500_s13  ;;  %v1963_v18 = vld [vmem:[#allocation11 + $0x10] sm:$0xff] }
 0x4b0   : > { %1146 = vmatpush.bf16.msrb.mxu1 %v1963_v18  ;;  %v1809_v18 = vld [vmem:[#allocation14 + $0x8] sm:$0xf0] }
 0x4b4   : > { %1147 = vmatpush.bf16.msrb.mxu1 %v1962_v20  ;;  %v1812_v20 = vor.u32 %v1969_v15, %v1809_v18 }
 0x4b8   : > { %1148 = vmatpush.bf16.msrb.mxu1 %v1961_v21  ;;  %v1992_v21 = vld [vmem:[#allocation15 + $0x38] sm:$0xff] }
 0x4f9   : > { %v911_v54 = vpop.xlane.xlu2 %910 }
 0x4fa   : > { %2150 = vrcp.f32 %v911_v54  ;;  %v1977_v54 = vld [vmem:[#allocation14 + $0x44] sm:$0xf] }
 0x500   : > { %v2151_v56 = vpop.eup %2150 }
 0x501   : > { %v913_v58 = vmul.f32 %v2151_v56, %v2145_v19  ;;  %v982_v59 = vpop.permute.xlu2 %981  ;;  %v1847_v19 = vld [vmem:[#allocation14 + $0x50] sm:$0xf]  ;;  %v1841_v56 = vld [vmem:[#allocation14 + $0x48] sm:$0xf0] }
 0x502   : > { %v987_v60 = vsel %vm855_vm5, %v982_v59, 0  ;;  %v1848_v49 = vor.u32 %v1980_v47, %v1847_v19  ;;  %v1844_v57 = vor.u32 %v1977_v54, %v1841_v56  ;;  %v1976_v59 = vld [vmem:[#allocation14 + $0x34] sm:$0xf0]  ;;  %v1995_v19 = vld [vmem:[#allocation15 + $0x50] sm:$0xff]  ;;  %v1986_v47 = vld [vmem:[#allocation15 + $0x8] sm:$0xff] }
 0x503   : > { %996 = vmatpush.bf16.msra.mxu2 %v987_v60  ;;  %v914_v61 = vpack.c.bf16 %v913_v58, %v913_v58  ;;  %v1831_v58 = vld [vmem:[#allocation14 + $0x30] sm:$0xf]  ;;  %v1975_v60 = vld [vmem:[#allocation14 + $0x34] sm:$0xf] }
 0x505   : > { %1768 = vmatmul.msk.bf16.vlgmr.msrb.gmra.mxu0 %vm839_vm6, %v914_v61  ;;  %v1832_v61 = vor.u32 %v1976_v59, %v1831_v58 }
 0x506   : > { %1770 = vmatmul.msk.bf16.vlgmr.msra.gmra.mxu2 %vm839_vm6, %v980_v62  ;;  %v1833_v62 = vld [vmem:[#allocation14 + $0x38] sm:$0xf0] }
 0x507   : > { %1288 = vmatpush.bf16.msrb.mxu2 %v1864_v35 }
 0x509   : > { %v1040_v63 = vpop.xlane.xlu1 %1039 }
 0x50a   : > { %2152 = vrcp.f32 %v1040_v63  ;;  %v1836_v63 = vor.u32 %v1975_v60, %v1833_v62 }
 0x50b   : > { %1289 = vmatpush.bf16.msrb.mxu2 %v1856_v44  ;;  %v1997_v44 = vld [vmem:[#allocation15 + $0x60] sm:$0xff] }
 0x50f   : > { %1290 = vmatpush.bf16.msrb.mxu2 %v1848_v49  ;;  %v1985_v49 = vld [vmem:[#allocation15] sm:$0xff] }
 0x510   : > { %v2153_v1 = vpop.eup %2152 }
 0x511   : > { %v1042_v2 = vmul.f32 %v2153_v1, %v2147_v51  ;;  %v1852_v51 = vor.u32 %v1979_v48, %v1849_v50  ;;  %v1823_v1 = vld [vmem:[#allocation14 + $0x20] sm:$0xf]  ;;  %v1994_v48 = vld [vmem:[#allocation15 + $0x48] sm:$0xff] }
 0x512   : > { %v1993_v50 = vld [vmem:[#allocation15 + $0x40] sm:$0xff] }
 0x513   : > { %v1043_v5 = vpack.c.bf16 %v1042_v2, %v1042_v2  ;;  %1303 = vmatpush.bf16.msra.mxu3 %v1852_v51  ;;  %1291 = vmatpush.bf16.msrb.mxu2 %v1840_v55  ;;  %v1974_v2 = vld [vmem:[#allocation14 + $0x24] sm:$0xf0]  ;;  %v1202_v51 = vld [vmem:[%s2869_s23] sm:$0x3]  ;;  %s2416_s23 = scalar_lea.hbm %s2415_s21, 8 }
 0x514   : > { %v1204_v52 = vperm.slane %v1202_v51, 0  ;;  %v1205_v53 = vperm.slane %v1202_v51, 1  ;;  %p2417_p1 = scmp.ne.s32.totalorder %s2415_s21, %s2416_s23  ;;  %p2422_p8 = scmp.lt.s32.totalorder %s2420_s1, %s2416_s23 }
 0x516   : > { %p2418_p3 = pnand %p2417_p1, %p2667_p13  ;;  %p2423_p7 = por %p2422_p8, %p2421_p12 }
 0x517   : > { %1304 = vmatpush.bf16.msra.mxu3 %v1844_v57  ;;  %1292 = vmatpush.bf16.msrb.mxu2 %v1832_v61 }
 0x518   : > { %p2419_p4 = pneg %p2418_p3 }
 0x51a   : > { %p2424_p9 = pnand %p2423_p7, %p2419_p4 }
 0x51b   : > { %1305 = vmatpush.bf16.msra.mxu3 %v1836_v63 }
 0x521   : > { %v1045_v3 = vpop.permute.xlu1 %1044 }
 0x522   : > { %v1050_v4 = vsel %vm855_vm5, %v1045_v3, 0  ;;  %v1973_v3 = vld [vmem:[#allocation14 + $0x24] sm:$0xf] }
 0x523   : > { %1059 = vmatpush.bf16.msra.mxu0 %v1050_v4  ;;  %v1824_v4 = vor.u32 %v1974_v2, %v1823_v1 }
 0x525   : > { %1293 = vmatpush.bf16.msrb.mxu2 %v1824_v4 }
 0x526   : > { %1772 = vmatmul.msk.bf16.vlgmr.msra.gmra.mxu0 %vm839_vm6, %v1043_v5  ;;  %v1825_v5 = vld [vmem:[#allocation14 + $0x28] sm:$0xf0] }
 0x527   : > { %1466 = vmatpush.bf16.msrb.mxu0 %v1992_v21 }
 0x582   : > { %v935_v6 = vpop.f32.mrf.mxu0 }
 0x583   : > { %940 = vrot.lane.b32.xlu0 %v935_v6, %s2500_s13  ;;  %v1828_v6 = vor.u32 %v1973_v3, %v1825_v5 }
 0x585   : > { %1306 = vmatpush.bf16.msra.mxu3 %v1828_v6 }
 0x589   : > { %v998_v7 = vpop.f32.mrf.mxu2 }
 0x58a   : > { %v937_v8 = vpop.f32.mrf.mxu0 }
 0x58b   : > { %1003 = vrot.lane.b32.xlu0 %v998_v7, %s2498_s22  ;;  %v1815_v7 = vld [vmem:[#allocation14 + $0x10] sm:$0xf]  ;;  %v1972_v8 = vld [vmem:[#allocation14 + $0x14] sm:$0xf0]  ;;  %s2870_s22 = sld [smem:[#allocation29_spill]] }
 0x58c   : > { %v1816_v10 = vor.u32 %v1972_v8, %v1815_v7 }
 0x58e   : > { %1294 = vmatpush.bf16.msrb.mxu2 %v1816_v10 }
 0x591   : > { %v1000_v11 = vpop.f32.mrf.mxu2  ;;  %v2133_v18 = vld [vmem:[%s2870_s22] ss:$0 sm:$0xff] }
 0x592   : > { %v1817_v11 = vld [vmem:[#allocation14 + $0x18] sm:$0xf0] }
 0x593   : > { %v1820_v12 = vor.u32 %v1971_v9, %v1817_v11 }
 0x595   : > { %1307 = vmatpush.bf16.msra.mxu3 %v1820_v12 }
 0x599   : > { %1308 = vmatpush.bf16.msra.mxu3 %v1812_v20 }
 0x5a3   : > { %v1061_v13 = vpop.f32.mrf.mxu0 }
 0x5a4   : > { %1066 = vrot.lane.b32.xlu2 %v1061_v13, %s2499_s24  ;;  %v1807_v13 = vld [vmem:[#allocation14] sm:$0xf] }
 0x5ab   : > { %v1063_v14 = vpop.f32.mrf.mxu0 }
 0x5ac   : > { %v1970_v14 = vld [vmem:[#allocation14 + $0x4] sm:$0xf0] }
 0x5ad   : > { %v1808_v17 = vor.u32 %v1970_v14, %v1807_v13 }
 0x5af   : > { %1295 = vmatpush.bf16.msrb.mxu2 %v1808_v17 }
 0x5f5   : > { %v941_v22 = vpop.permute.xlu0 %940 }
 0x5f6   : > { %944 = vst.msk [vmem:[#allocation2] sm:$0xff] %vm943_vm7, %v941_v22  ;;  %v2000_v22 = vld [vmem:[#allocation15 + $0x78] sm:$0xff] }
 0x5f7   : > { %1479 = vmatpush.bf16.msra.mxu1 %v2000_v22 }
 0x5fd   : > { %v1004_v23 = vpop.permute.xlu0 %1003 }
 0x5fe   : > { %1007 = vst.msk [vmem:[#allocation2] sm:$0xff] %vm1006_vm8, %v1004_v23  ;;  %v1067_v24 = vpop.permute.xlu2 %1066 }
 0x5ff   : > { %1070 = vst.msk [vmem:[#allocation2] sm:$0xff] %vm1069_vm9, %v1067_v24 }
 0x606   : > { %v1071_v25 = vld [vmem:[#allocation2] sm:$0xff] }
 0x607   : > { %v1072_v26 = vpack.c.bf16 %v1071_v25, %v1071_v25  ;;  %v1991_v25 = vld [vmem:[#allocation15 + $0x30] sm:$0xff] }
 0x608   : > { %1467 = vmatpush.bf16.msrb.mxu0 %v1991_v25 }
 0x609   : > { %1149 = vmatmul.bf16.vlgmr.msrb.gmra.mxu1 %v1072_v26  ;;  %v1999_v26 = vld [vmem:[#allocation15 + $0x70] sm:$0xff] }
 0x60a   : > { %1480 = vmatpush.bf16.msra.mxu1 %v1999_v26 }
 0x60c   : > { %1468 = vmatpush.bf16.msrb.mxu0 %v1990_v41 }
 0x60e   : > { %1481 = vmatpush.bf16.msra.mxu1 %v1998_v42 }
 0x610   : > { %1469 = vmatpush.bf16.msrb.mxu0 %v1989_v43 }
 0x612   : > { %1482 = vmatpush.bf16.msra.mxu1 %v1997_v44 }
 0x614   : > { %1470 = vmatpush.bf16.msrb.mxu0 %v1988_v45 }
 0x616   : > { %1483 = vmatpush.bf16.msra.mxu1 %v1996_v46 }
 0x61a   : > { %1484 = vmatpush.bf16.msra.mxu1 %v1995_v19 }
 0x61e   : > { %1485 = vmatpush.bf16.msra.mxu1 %v1994_v48 }
 0x622   : > { %1486 = vmatpush.bf16.msra.mxu1 %v1993_v50 }
 0x686   : > { %v1150_v28 = vpop.f32.mrf.mxu1 }
 0x687   : > { %v1151_v29 = vadd.f32 %v2130_v27, %v1150_v28 }
 0x689   : > { %v2778_v30 = vadd.f32 %v1151_v29, %v2724_v0 }
 0x68b   : > { %1157 = vadd.xlane.f32.xlu0 %v2778_v30 }
 0x68e   : > { %v1152_v31 = vpop.f32.mrf.mxu1 }
 0x6fe   : > { %v1158_v38 = vpop.xlane.xlu0 %1157 }
 0x6ff   : > { %v1159_v39 = vmul.f32 %v1158_v38, %v2727_v16 }
 0x701   : > { %v2783_v40 = vsub.f32 %v2778_v30, %v1159_v39 }
 0x703   : > { %v1161_v0 = vmul.f32 %v2783_v40, %v2783_v40 }
 0x705   : > { %1162 = vadd.xlane.f32.xlu1 %v1161_v0 }
 0x778   : > { %v1163_v23 = vpop.xlane.xlu1 %1162 }
 0x779   : > { %v1164_v24 = vmul.f32 %v1163_v23, %v2727_v16  ;;  %v2131_v16 = vld [vmem:[%s2844_s7] ss:$0 sm:$0xff] }
 0x77b   : > { %v1165_v27 = vadd.f32 1e-05, %v1164_v24 }
 0x77d   : > { %2154 = vrsqrt.f32 %v1165_v27  ;;  %vm1172_vm11 = vweird.f32 %v1165_v27 }
 0x783   : > { %v2155_v28 = vpop.eup %2154 }
 0x784   : > { %v1167_v29 = vmul.f32 %v2155_v28, %v1165_v27  ;;  %vm1173_vm10 = vweird.f32 %v2155_v28 }
 0x785   : > { %vm1174_vm12 = vmor %vm1172_vm11, %vm1173_vm10 }
 0x786   : > { %v1168_v31 = vmul.f32 %v2155_v28, %v1167_v29 }
 0x788   : > { %v1169_v32 = vmul.f32 0.5, %v1168_v31 }
 0x78a   : > { %v1170_v33 = vsub.f32 1.5, %v1169_v32 }
 0x78c   : > { %v1171_v34 = vmul.f32 %v2155_v28, %v1170_v33 }
 0x78e   : > { %v1175_v35 = vsel %vm1174_vm12, %v2155_v28, %v1171_v34 }
 0x78f   : > { %v1176_v36 = vmul.f32 %v1175_v35, %v2783_v40  ;;  %v1987_v40 = vld [vmem:[#allocation15 + $0x10] sm:$0xff] }
 0x790   : > { %1471 = vmatpush.bf16.msrb.mxu0 %v1987_v40 }
 0x791   : > { %v1180_v38 = vmul.f32 %v2131_v16, %v1176_v36 }
 0x793   : > { %v1184_v39 = vadd.f32 %v2132_v37, %v1180_v38 }
 0x794   : > { %1472 = vmatpush.bf16.msrb.mxu0 %v1986_v47 }
 0x795   : > { %v1185_v0 = vpack.c.bf16 %v1184_v39, %v1184_v39 }
 0x797   : > { %1296 = vmatmul.bf16.vlgmr.msrb.gmra.mxu2 %v1185_v0  ;;  %1309 = vmatmul.bf16.vlgmr.msra.gmra.mxu3 %v1185_v0 }
 0x798   : > { %1473 = vmatpush.bf16.msrb.mxu0 %v1985_v49 }
 0x81a   : > { %v1297_v54 = vpop.f32.mrf.mxu2  ;;  %v1310_v55 = vpop.f32.mrf.mxu3 }
 0x81b   : > { %v1298_v56 = vadd.f32 %v1297_v54, %v1204_v52  ;;  %v1311_v57 = vadd.f32 %v1310_v55, %v1205_v53 }
 0x81d   : > { %v1316_v58 = vmul.f32 0.044715, %v1298_v56  ;;  %v1317_v59 = vmul.f32 0.044715, %v1311_v57  ;;  %v1314_v9 = vmul.f32 0.5, %v1298_v56  ;;  %v1315_v11 = vmul.f32 0.5, %v1311_v57 }
 0x81f   : > { %v1318_v60 = vmul.f32 %v1316_v58, %v1298_v56  ;;  %v1319_v61 = vmul.f32 %v1317_v59, %v1311_v57 }
 0x821   : > { %v1320_v62 = vmul.f32 %v1318_v60, %v1298_v56  ;;  %v1321_v63 = vmul.f32 %v1319_v61, %v1311_v57 }
 0x822   : > { %v1299_v1 = vpop.f32.mrf.mxu2  ;;  %v1312_v2 = vpop.f32.mrf.mxu3 }
 0x823   : > { %v1322_v3 = vadd.f32 %v1320_v62, %v1298_v56  ;;  %v1323_v4 = vadd.f32 %v1321_v63, %v1311_v57 }
 0x825   : > { %v1324_v5 = vmul.f32 0.7978846, %v1322_v3  ;;  %v1325_v6 = vmul.f32 0.7978846, %v1323_v4 }
 0x827   : > { %2156 = vtanh.f32 %v1324_v5 }
 0x828   : > { %2158 = vtanh.f32 %v1325_v6 }
 0x82d   : > { %v2157_v7 = vpop.eup %2156 }
 0x82e   : > { %v2159_v8 = vpop.eup %2158  ;;  %v1328_v10 = vadd.f32 1.0, %v2157_v7 }
 0x82f   : > { %v1329_v12 = vadd.f32 1.0, %v2159_v8 }
 0x830   : > { %v1330_v13 = vmul.f32 %v1328_v10, %v1314_v9 }
 0x831   : > { %v1331_v14 = vmul.f32 %v1329_v12, %v1315_v11 }
 0x832   : > { %v1332_v15 = vpack.c.bf16 %v1330_v13, %v1330_v13 }
 0x833   : > { %v1333_v17 = vpack.c.bf16 %v1331_v14, %v1331_v14 }
 0x834   : > { %1474 = vmatmul.bf16.vlgmr.msrb.gmra.mxu0 %v1332_v15 }
 0x835   : > { %1487 = vmatmul.bf16.vlgmr.msra.gmra.mxu1 %v1333_v17 }
 0x8b1   : > { %v1475_v20 = vpop.f32.mrf.mxu0 }
 0x8b2   : > { %v1476_v21 = vadd.f32 %v2133_v18, %v1475_v20  ;;  %v1488_v22 = vpop.f32.mrf.mxu1 }
 0x8b4   : > { %v1489_v23 = vadd.f32 %v1488_v22, %v1476_v21 }
 0x8b6   : > { %v1492_v24 = vadd.f32 %v1489_v23, %v2778_v30 }
 0x8b8   : > { %1493 = vst [vmem:[%s567_s14] sm:$0xff] %v1492_v24 }
 0x8b9   : > { %v1477_v25 = vpop.f32.mrf.mxu0 }
 0x8ba   : > { %2427 = shalt.err (!%p2424_p9)
}
 0x8bb   : > { %2031 = dma.vmem_to_hbm [thread:$0]  (%p2667_p13), %s1508_s20, 128, %s1510_s18, %s1495_s15   ;;  %v1490_v30 = vpop.f32.mrf.mxu1 }
 0x8bc PF: > { %s1521_s17 = sand.u32 1, %s2470_s25   ;;  %p2872_p10 = scmp.ge.s32.totalorder %s2482_s28, 2 }
 0x8bd   : > { %s1522_s24 = scalar_lea.sflag [#allocation5], %s1521_s17 }
 0x8be   : > { %p2060_p11 = pnand %p2872_p10, %p2672_p5 }
 0x8c0   : > { %p2061_p0 = pneg %p2060_p11 }
 0x8c2   : > { %2465 = dma.done.wait (%p2061_p0), %s1522_s24, 128  }
 0x8c3   : > { %2467 = vsyncadd (%p2061_p0), %s1522_s24, 4294967168  ;;  %p30_p2 = scmp.ge.s32.totalorder %s2647_s12, 4   ;;  %s2873_s25 = smov %s2474_s26 }
 0x8c4   : > { %s2874_s26 = smov %s2478_s27  ;;  %s2875_s27 = smov %s2659_s10 }
 0x8c5   : > { %s2876_s28 = smov %s2647_s12  ;;  %32 = sbr.rel (!%p30_p2) target bundleno = 17 (0x11), region = 145 }
 0x8ca   :  { %1528 = vsyncpa [#allocation4], 1 }
 0x8cb   :  { %1530 = vsyncpa [#allocation4 + $0x1], 1 }
 0x8cc   :  { %1531 = vsyncpa [#allocation7], 1 }
 0x8cd   :  { %1532 = vsyncpa [#allocation10], 1 }
 0x8ce   :  { %1533 = vsyncpa [#allocation13], 1 }
 0x8cf   :  { %1534 = vsyncpa [#allocation16], 1 }
 0x8d0   :  { %1535 = vsyncpa [#allocation5], 1 }
 0x8d1   :  { %1537 = vsyncpa [#allocation5 + $0x1], 1 }

</bundles_post_ra>
